<compile_context>
chip_gen: v5e
topology: v5e:2x2
jax: 0.10.0
libtpu: 0.0.40
codegen_flags: <defaults>
</compile_context>

<pallas_src>
import numpy as np
import jax
import jax.numpy as jnp
from jax.experimental import pallas as pl
from jax.experimental.pallas import tpu as pltpu

AMINO_ACIDS_VOCAB = 'ACDEFGHIKLMNPQRSTVWY'
PAD_ID = 0            # '<PAD>'
EOS_ID = 1            # '<EOS>'
VOCAB_SIZE = 2 + len(AMINO_ACIDS_VOCAB)   # 22
LM_PAD = 128          # lane-dense lm_head output width (sliced back to 22)

# small synthetic ProtT5-style config
D_MODEL = 32
N_HEADS = 4
D_HEAD = 8
D_FF = 64
N_LAYERS = 2
REL_BUCKETS = 32
REL_MAX_DIST = 128
LORA_R = 4
LORA_ALPHA = 8
LORA_SCALE = LORA_ALPHA / LORA_R
LN_EPS = 1e-6


# --------------------------- fused Pallas kernel -----------------------------

def _fused_encoder_kernel(ids_ref, embed_ref, pos_bias_ref,
                          ln_attn_ref, wq_ref, wk_ref, wv_ref, wo_ref,
                          ln_ff_ref, wi_ref, wo_ff_ref,
                          ln_final_ref, lm_w_ref, lm_b_ref,
                          out_ref):
    """One grid step = TB batch rows; whole encoder stack runs in VMEM/vregs."""
    TB, S = ids_ref.shape
    V, D = embed_ref.shape
    n_layers = wq_ref.shape[0]
    n_heads = pos_bias_ref.shape[0]
    inner = wq_ref.shape[2]
    d_head = inner // n_heads
    N = TB * S                                   # flattened rows fed to the MXU

    def rmsnorm(x, w):                           # T5 LayerNorm: RMS, no mean/bias (f32)
        var = jnp.mean(x * x, axis=-1, keepdims=True)
        return x * jax.lax.rsqrt(var + LN_EPS) * w

    def mm(a, b):                                # bf16 x bf16 -> f32 accumulate on MXU
        return jnp.dot(a, b, preferred_element_type=jnp.float32)

    # ---- token embedding via one-hot @ table (exact gather, stays on the MXU) ----
    ids = ids_ref[...]                                               # (TB, S) int32
    onehot = (ids[:, :, None] ==
              jax.lax.broadcasted_iota(jnp.int32, (TB, S, V), 2)
              ).astype(jnp.float32)                                  # (TB, S, V)
    h = jnp.dot(onehot.reshape(N, V), embed_ref[...],
                preferred_element_type=jnp.float32)                  # (N, D) f32

    # ---- additive key-padding bias derived in-kernel from the same ids block ----
    # attention_mask = (input_ids != pad) in the original module.
    key_bias = jnp.where(ids == PAD_ID, -1e9, 0.0
                         ).astype(jnp.float32)[:, None, :]           # (TB, 1, S)

    for l in range(n_layers):                    # TODO(synk): grid axis / fori_loop at 24 layers
        # ------------------ self-attention (LoRA pre-merged into wq/wv) ------------------
        xn = rmsnorm(h, ln_attn_ref[l]).astype(jnp.bfloat16)         # (N, D)
        q = mm(xn, wq_ref[l]).astype(jnp.bfloat16).reshape(TB, S, inner)
        k = mm(xn, wk_ref[l]).astype(jnp.bfloat16).reshape(TB, S, inner)
        v = mm(xn, wv_ref[l]).astype(jnp.bfloat16).reshape(TB, S, inner)

        ctx_heads = []
        for hd in range(n_heads):
            lo = hd * d_head
            qh = q[:, :, lo:lo + d_head]                             # (TB, S, d)
            kh = k[:, :, lo:lo + d_head]
            vh = v[:, :, lo:lo + d_head]
            # T5: no 1/sqrt(d) scaling; bias = rel-pos bias + key padding mask.
            s = jnp.einsum('bqd,bkd->bqk', qh, kh,
                           preferred_element_type=jnp.float32)       # (TB, S, S)
            s = s + pos_bias_ref[hd][None] + key_bias
            s = s - jnp.max(s, axis=-1, keepdims=True)
            p = jnp.exp(s)
            p = p * pl.reciprocal(jnp.sum(p, axis=-1, keepdims=True), approx=True)
            ctx_heads.append(jnp.einsum('bqk,bkd->bqd', p.astype(jnp.bfloat16), vh,
                                        preferred_element_type=jnp.float32))
        # single well-shaped output projection after the head loop
        ctx = jnp.concatenate(ctx_heads, axis=-1).reshape(N, inner).astype(jnp.bfloat16)
        h = h + mm(ctx, wo_ref[l])                                   # (N, D)

        # ------------------ feed-forward (T5 DenseReluDense) ------------------
        xn = rmsnorm(h, ln_ff_ref[l]).astype(jnp.bfloat16)
        ff = jnp.maximum(mm(xn, wi_ref[l]), 0.0).astype(jnp.bfloat16)
        h = h + mm(ff, wo_ff_ref[l])

    # ---- final RMSNorm + lm_head (128-lane padded output: unmasked stores) ----
    h = rmsnorm(h, ln_final_ref[...]).astype(jnp.bfloat16)
    logits = mm(h, lm_w_ref[...]) + lm_b_ref[...]                    # (N, LM_PAD)
    out_ref[...] = logits.reshape(TB, S, LM_PAD).astype(out_ref.dtype)


def forward(fused, input_ids, *, batch_block=None):
    """Full AdvancedProtT5Generator.forward as one pallas_call; returns (B,S,V)."""
    B, S = input_ids.shape
    # Whole batch in a single grid step by default (best on v5e/v6e single TC).
    # On v7x pass batch_block = ceil(B/2) so grid length 2 feeds both TensorCores.
    tb = B if batch_block is None else batch_block
    assert B % tb == 0, (B, tb)
    grid = (B // tb,)
    ids = input_ids.astype(jnp.int32)

    def full_block(arr):
        nd = arr.ndim
        # Constant across the grid -> fetched once.  TODO(synk): at real dims /
        # multi-step grids add pipeline_mode=pl.Buffered(1) and stream per layer.
        return pl.BlockSpec(arr.shape, lambda i, _nd=nd: (0,) * _nd)

    out = pl.pallas_call(
        _fused_encoder_kernel,
        out_shape=jax.ShapeDtypeStruct((B, S, LM_PAD), jnp.float32),
        grid=grid,
        in_specs=[
            pl.BlockSpec((tb, S), lambda i: (i, 0)),      # single ids input
            full_block(fused['embed']),
            full_block(fused['pos_bias']),
            full_block(fused['ln_attn']),
            full_block(fused['wq']),
            full_block(fused['wk']),
            full_block(fused['wv']),
            full_block(fused['wo']),
            full_block(fused['ln_ff']),
            full_block(fused['wi']),
            full_block(fused['wo_ff']),
            full_block(fused['ln_final']),
            full_block(fused['lm_w']),
            full_block(fused['lm_b']),
        ],
        out_specs=pl.BlockSpec((tb, S, LM_PAD), lambda i: (i, 0, 0)),
        compiler_params=pltpu.CompilerParams(
            dimension_semantics=("parallel",)),
    )(ids, fused['embed'], fused['pos_bias'], fused['ln_attn'],
      fused['wq'], fused['wk'], fused['wv'], fused['wo'],
      fused['ln_ff'], fused['wi'], fused['wo_ff'],
      fused['ln_final'], fused['lm_w'], fused['lm_b'])
    return out[:, :, :VOCAB_SIZE]


# --------------------------- one-time parameter prep -------------------------

def _relative_position_bucket_np(relative_position,
                                 num_buckets=REL_BUCKETS, max_distance=REL_MAX_DIST):
    num_buckets //= 2
    ret = (relative_position > 0).astype(np.int32) * num_buckets
    n = np.abs(relative_position)
    max_exact = num_buckets // 2
    is_small = n < max_exact
    n_f = np.maximum(n, 1).astype(np.float32)
    val_if_large = max_exact + (
        np.log(n_f / max_exact) / np.log(max_distance / max_exact)
        * (num_buckets - max_exact)).astype(np.int32)
    val_if_large = np.minimum(val_if_large, num_buckets - 1)
    return ret + np.where(is_small, n, val_if_large)


def compute_position_bias(rel_embed, seq_len):
    """(H, S, S) relative-position bias; bucket math is host-side numpy (S static).
    TODO(synk): at real S tile this per (head, q-block, k-block) instead of keeping
    the full (H,S,S) tensor resident in VMEM."""
    ctx = np.arange(seq_len)[:, None]
    mem = np.arange(seq_len)[None, :]
    bucket = _relative_position_bucket_np(mem - ctx)        # (S, S) host constant
    values = jnp.asarray(rel_embed)[bucket]                 # (S, S, H)
    return jnp.transpose(values, (2, 0, 1)).astype(jnp.float32)   # (H, S, S)


def prepare_fused_params(params, seq_len):
    """Done ONCE outside the jitted forward: merge LoRA into W (eval mode, frozen,
    dropout off), stack per-layer tensors, precompute the relative-position bias,
    cast dense weights to bf16 (MXU operands), and pad lm_head to 128 lanes."""
    layers = params['layers']
    wq, wk, wv, wo, wi, wo_ff, ln_attn, ln_ff = [], [], [], [], [], [], [], []
    for lyr in layers:
        wq.append(lyr['wq'] + LORA_SCALE * (lyr['lora_q_a'] @ lyr['lora_q_b']))
        wk.append(lyr['wk'])
        wv.append(lyr['wv'] + LORA_SCALE * (lyr['lora_v_a'] @ lyr['lora_v_b']))
        wo.append(lyr['wo'])
        wi.append(lyr['wi'])
        wo_ff.append(lyr['wo_ff'])
        ln_attn.append(lyr['ln_attn'])
        ln_ff.append(lyr['ln_ff'])
    L = len(layers)
    D = params['embed'].shape[1]
    wdt = jnp.bfloat16      # matmul-operand dtype (elementwise math stays f32)
    lm_w = jnp.zeros((D, LM_PAD), jnp.float32).at[:, :VOCAB_SIZE].set(
        params['lm_head_w'].astype(jnp.float32)).astype(wdt)
    lm_b = jnp.zeros((1, LM_PAD), jnp.float32).at[0, :VOCAB_SIZE].set(
        params['lm_head_b'].astype(jnp.float32))
    return {
        'embed': params['embed'].astype(jnp.float32),   # f32: exact one-hot gather
        'pos_bias': compute_position_bias(params['rel_attn_bias'], seq_len),
        'ln_attn': jnp.stack(ln_attn).reshape(L, 1, D).astype(jnp.float32),
        'wq': jnp.stack(wq).astype(wdt),
        'wk': jnp.stack(wk).astype(wdt),
        'wv': jnp.stack(wv).astype(wdt),
        'wo': jnp.stack(wo).astype(wdt),
        'ln_ff': jnp.stack(ln_ff).reshape(L, 1, D).astype(jnp.float32),
        'wi': jnp.stack(wi).astype(wdt),
        'wo_ff': jnp.stack(wo_ff).astype(wdt),
        'ln_final': params['ln_final'].reshape(1, D).astype(jnp.float32),
        'lm_w': lm_w,
        'lm_b': lm_b,
    }


# --------------------------- unfused pure-JAX reference ----------------------

def reference_forward(params, input_ids):
    """Mirror of the original module semantics (separate LoRA path), f32, for checking."""
    B, S = input_ids.shape
    mask = (input_ids != PAD_ID).astype(jnp.float32)
    h = jnp.take(params['embed'], input_ids, axis=0)                   # (B, S, D)
    pos_bias = compute_position_bias(params['rel_attn_bias'], S)       # (H, S, S)
    bias = pos_bias[None] + (1.0 - mask)[:, None, None, :] * -1e9      # (B, H, S, S)

    def rmsnorm(x, w):
        var = jnp.mean(x * x, axis=-1, keepdims=True)
        return x * jax.lax.rsqrt(var + LN_EPS) * w

    inner = N_HEADS * D_HEAD
    for lyr in params['layers']:
        normed = rmsnorm(h, lyr['ln_attn'])
        q = normed @ lyr['wq'] + LORA_SCALE * ((normed @ lyr['lora_q_a']) @ lyr['lora_q_b'])
        k = normed @ lyr['wk']
        v = normed @ lyr['wv'] + LORA_SCALE * ((normed @ lyr['lora_v_a']) @ lyr['lora_v_b'])

        def split(x):
            return x.reshape(B, S, N_HEADS, D_HEAD).transpose(0, 2, 1, 3)
        qh, kh, vh = split(q), split(k), split(v)
        s = jnp.einsum('bhqd,bhkd->bhqk', qh, kh) + bias
        p = jax.nn.softmax(s, axis=-1)
        ctx = jnp.einsum('bhqk,bhkd->bhqd', p, vh).transpose(0, 2, 1, 3).reshape(B, S, inner)
        h = h + ctx @ lyr['wo']
        normed = rmsnorm(h, lyr['ln_ff'])
        h = h + jnp.maximum(normed @ lyr['wi'], 0.0) @ lyr['wo_ff']
    h = rmsnorm(h, params['ln_final'])
    return h @ params['lm_head_w'] + params['lm_head_b']


# --------------------------- synthetic params ---------------------------------

def init_params(key):
    def nrm(k, shape, scale=0.02):
        return scale * jax.random.normal(k, shape, dtype=jnp.float32)

    keys = jax.random.split(key, 4 + N_LAYERS)
    params = {
        'embed': nrm(keys[0], (VOCAB_SIZE, D_MODEL), 1.0),
        'rel_attn_bias': nrm(keys[1], (REL_BUCKETS, N_HEADS), 0.1),
        'ln_final': jnp.ones((D_MODEL,), jnp.float32),
        'lm_head_w': nrm(keys[2], (D_MODEL, VOCAB_SIZE)),
        'lm_head_b': jnp.zeros((VOCAB_SIZE,), jnp.float32),
        'layers': [],
    }
    inner = N_HEADS * D_HEAD
    for li in range(N_LAYERS):
        lk = jax.random.split(keys[4 + li], 10)
        params['layers'].append({
            'ln_attn': jnp.ones((D_MODEL,), jnp.float32),
            'wq': nrm(lk[0], (D_MODEL, inner)),
            'wk': nrm(lk[1], (D_MODEL, inner)),
            'wv': nrm(lk[2], (D_MODEL, inner)),
            'wo': nrm(lk[3], (inner, D_MODEL)),
            'lora_q_a': nrm(lk[4], (D_MODEL, LORA_R)),
            'lora_q_b': nrm(lk[5], (LORA_R, inner)),
            'lora_v_a': nrm(lk[6], (D_MODEL, LORA_R)),
            'lora_v_b': nrm(lk[7], (LORA_R, inner)),
            'ln_ff': jnp.ones((D_MODEL,), jnp.float32),
            'wi': nrm(lk[8], (D_MODEL, D_FF)),
            'wo_ff': nrm(lk[9], (D_FF, D_MODEL)),
        })
    return params


if __name__ == "__main__":
    key = jax.random.PRNGKey(0)
    pkey, dkey = jax.random.split(key)
    params = init_params(pkey)

    B, S = 2, 8
    input_ids = jax.random.randint(dkey, (B, S), 2, VOCAB_SIZE, dtype=jnp.int32)
    input_ids = input_ids.at[0, 6:].set(PAD_ID)   # exercise the attention-mask path

    # One-time prep (outside jit): LoRA merge, weight stacking + bf16 cast,
    # pos-bias precompute, lm_head lane padding.
    fused = prepare_fused_params(params, S)

    logits = jax.jit(forward)(fused, input_ids)
    logits = jax.block_until_ready(logits)

    assert logits.shape == (B, S, VOCAB_SIZE), logits.shape
    assert bool(jnp.all(jnp.isfinite(logits)))

    # Verify the fused bf16-weight kernel against the unfused f32 reference.
    ref = reference_forward(params, input_ids)
    max_err = float(jnp.max(jnp.abs(logits - ref)))
    assert max_err < 2e-2, max_err
    print("KERNEL_OK")
</pallas_src>

<mosaic_0001>
module attributes {stable_mosaic.version = 11 : i64} {
  func.func @_fused_encoder_kernel(%arg0: i32, %arg1: memref<2x8xi32, #tpu.memory_space<vmem>>, %arg2: memref<22x32xf32, #tpu.memory_space<vmem>>, %arg3: memref<4x8x8xf32, #tpu.memory_space<vmem>>, %arg4: memref<2x1x32xf32, #tpu.memory_space<vmem>>, %arg5: memref<2x32x32xbf16, #tpu.memory_space<vmem>>, %arg6: memref<2x32x32xbf16, #tpu.memory_space<vmem>>, %arg7: memref<2x32x32xbf16, #tpu.memory_space<vmem>>, %arg8: memref<2x32x32xbf16, #tpu.memory_space<vmem>>, %arg9: memref<2x1x32xf32, #tpu.memory_space<vmem>>, %arg10: memref<2x32x64xbf16, #tpu.memory_space<vmem>>, %arg11: memref<2x64x32xbf16, #tpu.memory_space<vmem>>, %arg12: memref<1x32xf32, #tpu.memory_space<vmem>>, %arg13: memref<32x128xbf16, #tpu.memory_space<vmem>>, %arg14: memref<1x128xf32, #tpu.memory_space<vmem>>, %arg15: memref<2x8x128xf32, #tpu.memory_space<vmem>>) attributes {dimension_semantics = [#tpu.dimension_semantics<parallel>], iteration_bounds = array<i64: 1>, scalar_prefetch = 0 : i64, scratch_operands = 0 : i64, tpu.core_type = #tpu.core_type<tc>, window_params = [{transform_indices = @transform_0, window_bounds = array<i64: 2, 8>}, {pipeline_mode = #tpu.pipeline_mode<synchronous>, transform_indices = @transform_1, window_bounds = array<i64: 22, 32>}, {pipeline_mode = #tpu.pipeline_mode<synchronous>, transform_indices = @transform_2, window_bounds = array<i64: 4, 8, 8>}, {pipeline_mode = #tpu.pipeline_mode<synchronous>, transform_indices = @transform_3, window_bounds = array<i64: 2, 1, 32>}, {pipeline_mode = #tpu.pipeline_mode<synchronous>, transform_indices = @transform_4, window_bounds = array<i64: 2, 32, 32>}, {pipeline_mode = #tpu.pipeline_mode<synchronous>, transform_indices = @transform_5, window_bounds = array<i64: 2, 32, 32>}, {pipeline_mode = #tpu.pipeline_mode<synchronous>, transform_indices = @transform_6, window_bounds = array<i64: 2, 32, 32>}, {pipeline_mode = #tpu.pipeline_mode<synchronous>, transform_indices = @transform_7, window_bounds = array<i64: 2, 32, 32>}, {pipeline_mode = #tpu.pipeline_mode<synchronous>, transform_indices = @transform_8, window_bounds = array<i64: 2, 1, 32>}, {pipeline_mode = #tpu.pipeline_mode<synchronous>, transform_indices = @transform_9, window_bounds = array<i64: 2, 32, 64>}, {pipeline_mode = #tpu.pipeline_mode<synchronous>, transform_indices = @transform_10, window_bounds = array<i64: 2, 64, 32>}, {pipeline_mode = #tpu.pipeline_mode<synchronous>, transform_indices = @transform_11, window_bounds = array<i64: 1, 32>}, {pipeline_mode = #tpu.pipeline_mode<synchronous>, transform_indices = @transform_12, window_bounds = array<i64: 32, 128>}, {pipeline_mode = #tpu.pipeline_mode<synchronous>, transform_indices = @transform_13, window_bounds = array<i64: 1, 128>}, {transform_indices = @transform_14, window_bounds = array<i64: 2, 8, 128>}]} {
    %c0 = arith.constant 0 : index
    %c0_0 = arith.constant 0 : index
    %0 = vector.load %arg1[%c0, %c0_0] : memref<2x8xi32, #tpu.memory_space<vmem>>, vector<2x8xi32>
    %1 = vector.shape_cast %0 : vector<2x8xi32> to vector<2x8x1xi32>
    %2 = tpu.iota {dimensions = array<i32: 2>} : vector<2x8x22xi32>
    %3 = vector.broadcast %1 : vector<2x8x1xi32> to vector<2x8x22xi32>
    %4 = arith.cmpi eq, %3, %2 : vector<2x8x22xi32>
    %5 = arith.extui %4 : vector<2x8x22xi1> to vector<2x8x22xi32>
    %6 = arith.sitofp %5 : vector<2x8x22xi32> to vector<2x8x22xf32>
    %7 = vector.shape_cast %6 : vector<2x8x22xf32> to vector<16x22xf32>
    %c0_1 = arith.constant 0 : index
    %c0_2 = arith.constant 0 : index
    %8 = vector.load %arg2[%c0_1, %c0_2] : memref<22x32xf32, #tpu.memory_space<vmem>>, vector<22x32xf32>
    %cst = arith.constant dense<0.000000e+00> : vector<16x32xf32>
    %9 = tpu.matmul %7, %8, %cst {dimension_numbers = #tpu.dot_dimension_numbers<[1], [0], [0], [1], [0, 0, 1, 1], [], []>} : vector<16x22xf32>, vector<22x32xf32>, vector<16x32xf32> -> vector<16x32xf32>
    %c0_i32 = arith.constant 0 : i32
    %10 = vector.broadcast %c0_i32 : i32 to vector<2x8xi32>
    %11 = arith.cmpi eq, %0, %10 : vector<2x8xi32>
    %cst_3 = arith.constant -1.000000e+09 : f32
    %cst_4 = arith.constant 0.000000e+00 : f32
    %12 = vector.broadcast %cst_3 : f32 to vector<2x8xf32>
    %13 = vector.broadcast %cst_4 : f32 to vector<2x8xf32>
    %14 = arith.select %11, %12, %13 : vector<2x8xi1>, vector<2x8xf32>
    %15 = vector.shape_cast %14 : vector<2x8xf32> to vector<2x1x8xf32>
    %c0_5 = arith.constant 0 : index
    %c0_6 = arith.constant 0 : index
    %c0_7 = arith.constant 0 : index
    %16 = vector.load %arg4[%c0_5, %c0_6, %c0_7] : memref<2x1x32xf32, #tpu.memory_space<vmem>>, vector<1x1x32xf32>
    %17 = vector.shape_cast %16 : vector<1x1x32xf32> to vector<1x32xf32>
    %18 = arith.mulf %9, %9 : vector<16x32xf32>
    %cst_8 = arith.constant dense<0.000000e+00> : vector<16xf32>
    %19 = vector.multi_reduction <add>, %18, %cst_8 [1] : vector<16x32xf32> to vector<16xf32>
    %20 = vector.shape_cast %19 : vector<16xf32> to vector<16x1xf32>
    %cst_9 = arith.constant 3.200000e+01 : f32
    %21 = vector.broadcast %cst_9 : f32 to vector<16x1xf32>
    %22 = arith.divf %20, %21 : vector<16x1xf32>
    %cst_10 = arith.constant 9.99999997E-7 : f32
    %23 = vector.broadcast %cst_10 : f32 to vector<16x1xf32>
    %24 = arith.addf %22, %23 : vector<16x1xf32>
    %25 = math.rsqrt %24 : vector<16x1xf32>
    %26 = vector.broadcast %25 : vector<16x1xf32> to vector<16x32xf32>
    %27 = arith.mulf %9, %26 : vector<16x32xf32>
    %28 = vector.broadcast %17 : vector<1x32xf32> to vector<16x32xf32>
    %29 = arith.mulf %27, %28 : vector<16x32xf32>
    %30 = arith.truncf %29 : vector<16x32xf32> to vector<16x32xbf16>
    %c0_11 = arith.constant 0 : index
    %c0_12 = arith.constant 0 : index
    %c0_13 = arith.constant 0 : index
    %31 = vector.load %arg5[%c0_11, %c0_12, %c0_13] : memref<2x32x32xbf16, #tpu.memory_space<vmem>>, vector<1x32x32xbf16>
    %32 = vector.shape_cast %31 : vector<1x32x32xbf16> to vector<32x32xbf16>
    %cst_14 = arith.constant dense<0.000000e+00> : vector<16x32xf32>
    %33 = tpu.matmul %30, %32, %cst_14 {dimension_numbers = #tpu.dot_dimension_numbers<[1], [0], [0], [1], [0, 0, 1, 1], [], []>} : vector<16x32xbf16>, vector<32x32xbf16>, vector<16x32xf32> -> vector<16x32xf32>
    %34 = arith.truncf %33 : vector<16x32xf32> to vector<16x32xbf16>
    %35 = vector.shape_cast %34 : vector<16x32xbf16> to vector<2x8x32xbf16>
    %c0_15 = arith.constant 0 : index
    %c0_16 = arith.constant 0 : index
    %c0_17 = arith.constant 0 : index
    %36 = vector.load %arg6[%c0_15, %c0_16, %c0_17] : memref<2x32x32xbf16, #tpu.memory_space<vmem>>, vector<1x32x32xbf16>
    %37 = vector.shape_cast %36 : vector<1x32x32xbf16> to vector<32x32xbf16>
    %cst_18 = arith.constant dense<0.000000e+00> : vector<16x32xf32>
    %38 = tpu.matmul %30, %37, %cst_18 {dimension_numbers = #tpu.dot_dimension_numbers<[1], [0], [0], [1], [0, 0, 1, 1], [], []>} : vector<16x32xbf16>, vector<32x32xbf16>, vector<16x32xf32> -> vector<16x32xf32>
    %39 = arith.truncf %38 : vector<16x32xf32> to vector<16x32xbf16>
    %40 = vector.shape_cast %39 : vector<16x32xbf16> to vector<2x8x32xbf16>
    %c0_19 = arith.constant 0 : index
    %c0_20 = arith.constant 0 : index
    %c0_21 = arith.constant 0 : index
    %41 = vector.load %arg7[%c0_19, %c0_20, %c0_21] : memref<2x32x32xbf16, #tpu.memory_space<vmem>>, vector<1x32x32xbf16>
    %42 = vector.shape_cast %41 : vector<1x32x32xbf16> to vector<32x32xbf16>
    %cst_22 = arith.constant dense<0.000000e+00> : vector<16x32xf32>
    %43 = tpu.matmul %30, %42, %cst_22 {dimension_numbers = #tpu.dot_dimension_numbers<[1], [0], [0], [1], [0, 0, 1, 1], [], []>} : vector<16x32xbf16>, vector<32x32xbf16>, vector<16x32xf32> -> vector<16x32xf32>
    %44 = arith.truncf %43 : vector<16x32xf32> to vector<16x32xbf16>
    %45 = vector.shape_cast %44 : vector<16x32xbf16> to vector<2x8x32xbf16>
    %46 = vector.extract_strided_slice %35 {offsets = [0, 0, 0], sizes = [2, 8, 8], strides = [1, 1, 1]} : vector<2x8x32xbf16> to vector<2x8x8xbf16>
    %47 = vector.extract_strided_slice %40 {offsets = [0, 0, 0], sizes = [2, 8, 8], strides = [1, 1, 1]} : vector<2x8x32xbf16> to vector<2x8x8xbf16>
    %48 = vector.extract_strided_slice %45 {offsets = [0, 0, 0], sizes = [2, 8, 8], strides = [1, 1, 1]} : vector<2x8x32xbf16> to vector<2x8x8xbf16>
    "tpu.trace_start"() <{level = 10 : i32, message = "bqd,bkd->bqk"}> : () -> ()
    %cst_23 = arith.constant dense<0.000000e+00> : vector<2x8x8xf32>
    %49 = tpu.matmul %46, %47, %cst_23 {dimension_numbers = #tpu.dot_dimension_numbers<[2], [2], [1], [1], [0, 0, 0, 1, 1, 1], [0], [0]>} : vector<2x8x8xbf16>, vector<2x8x8xbf16>, vector<2x8x8xf32> -> vector<2x8x8xf32>
    "tpu.trace_stop"() : () -> ()
    %c0_24 = arith.constant 0 : index
    %c0_25 = arith.constant 0 : index
    %c0_26 = arith.constant 0 : index
    %50 = vector.load %arg3[%c0_24, %c0_25, %c0_26] : memref<4x8x8xf32, #tpu.memory_space<vmem>>, vector<1x8x8xf32>
    %51 = vector.shape_cast %50 : vector<1x8x8xf32> to vector<8x8xf32>
    %52 = vector.shape_cast %51 : vector<8x8xf32> to vector<1x8x8xf32>
    %53 = vector.broadcast %52 : vector<1x8x8xf32> to vector<2x8x8xf32>
    %54 = arith.addf %49, %53 : vector<2x8x8xf32>
    %55 = vector.broadcast %15 : vector<2x1x8xf32> to vector<2x8x8xf32>
    %56 = arith.addf %54, %55 : vector<2x8x8xf32>
    %cst_27 = arith.constant dense<0xFF800000> : vector<2x8xf32>
    %57 = vector.multi_reduction <maximumf>, %56, %cst_27 [2] : vector<2x8x8xf32> to vector<2x8xf32>
    %58 = vector.shape_cast %57 : vector<2x8xf32> to vector<2x8x1xf32>
    %59 = vector.broadcast %58 : vector<2x8x1xf32> to vector<2x8x8xf32>
    %60 = arith.subf %56, %59 : vector<2x8x8xf32>
    %61 = math.exp %60 : vector<2x8x8xf32>
    %cst_28 = arith.constant dense<0.000000e+00> : vector<2x8xf32>
    %62 = vector.multi_reduction <add>, %61, %cst_28 [2] : vector<2x8x8xf32> to vector<2x8xf32>
    %63 = vector.shape_cast %62 : vector<2x8xf32> to vector<2x8x1xf32>
    %64 = tpu.reciprocal %63 {approx = true} : vector<2x8x1xf32> -> vector<2x8x1xf32>
    %65 = vector.broadcast %64 : vector<2x8x1xf32> to vector<2x8x8xf32>
    %66 = arith.mulf %61, %65 : vector<2x8x8xf32>
    %67 = arith.truncf %66 : vector<2x8x8xf32> to vector<2x8x8xbf16>
    "tpu.trace_start"() <{level = 10 : i32, message = "bqk,bkd->bqd"}> : () -> ()
    %cst_29 = arith.constant dense<0.000000e+00> : vector<2x8x8xf32>
    %68 = tpu.matmul %67, %48, %cst_29 {dimension_numbers = #tpu.dot_dimension_numbers<[2], [1], [1], [2], [0, 0, 0, 1, 1, 2], [0], [0]>} : vector<2x8x8xbf16>, vector<2x8x8xbf16>, vector<2x8x8xf32> -> vector<2x8x8xf32>
    "tpu.trace_stop"() : () -> ()
    %69 = vector.extract_strided_slice %35 {offsets = [0, 0, 8], sizes = [2, 8, 8], strides = [1, 1, 1]} : vector<2x8x32xbf16> to vector<2x8x8xbf16>
    %70 = vector.extract_strided_slice %40 {offsets = [0, 0, 8], sizes = [2, 8, 8], strides = [1, 1, 1]} : vector<2x8x32xbf16> to vector<2x8x8xbf16>
    %71 = vector.extract_strided_slice %45 {offsets = [0, 0, 8], sizes = [2, 8, 8], strides = [1, 1, 1]} : vector<2x8x32xbf16> to vector<2x8x8xbf16>
    "tpu.trace_start"() <{level = 10 : i32, message = "bqd,bkd->bqk"}> : () -> ()
    %cst_30 = arith.constant dense<0.000000e+00> : vector<2x8x8xf32>
    %72 = tpu.matmul %69, %70, %cst_30 {dimension_numbers = #tpu.dot_dimension_numbers<[2], [2], [1], [1], [0, 0, 0, 1, 1, 1], [0], [0]>} : vector<2x8x8xbf16>, vector<2x8x8xbf16>, vector<2x8x8xf32> -> vector<2x8x8xf32>
    "tpu.trace_stop"() : () -> ()
    %c1 = arith.constant 1 : index
    %c0_31 = arith.constant 0 : index
    %c0_32 = arith.constant 0 : index
    %73 = vector.load %arg3[%c1, %c0_31, %c0_32] : memref<4x8x8xf32, #tpu.memory_space<vmem>>, vector<1x8x8xf32>
    %74 = vector.shape_cast %73 : vector<1x8x8xf32> to vector<8x8xf32>
    %75 = vector.shape_cast %74 : vector<8x8xf32> to vector<1x8x8xf32>
    %76 = vector.broadcast %75 : vector<1x8x8xf32> to vector<2x8x8xf32>
    %77 = arith.addf %72, %76 : vector<2x8x8xf32>
    %78 = vector.broadcast %15 : vector<2x1x8xf32> to vector<2x8x8xf32>
    %79 = arith.addf %77, %78 : vector<2x8x8xf32>
    %cst_33 = arith.constant dense<0xFF800000> : vector<2x8xf32>
    %80 = vector.multi_reduction <maximumf>, %79, %cst_33 [2] : vector<2x8x8xf32> to vector<2x8xf32>
    %81 = vector.shape_cast %80 : vector<2x8xf32> to vector<2x8x1xf32>
    %82 = vector.broadcast %81 : vector<2x8x1xf32> to vector<2x8x8xf32>
    %83 = arith.subf %79, %82 : vector<2x8x8xf32>
    %84 = math.exp %83 : vector<2x8x8xf32>
    %cst_34 = arith.constant dense<0.000000e+00> : vector<2x8xf32>
    %85 = vector.multi_reduction <add>, %84, %cst_34 [2] : vector<2x8x8xf32> to vector<2x8xf32>
    %86 = vector.shape_cast %85 : vector<2x8xf32> to vector<2x8x1xf32>
    %87 = tpu.reciprocal %86 {approx = true} : vector<2x8x1xf32> -> vector<2x8x1xf32>
    %88 = vector.broadcast %87 : vector<2x8x1xf32> to vector<2x8x8xf32>
    %89 = arith.mulf %84, %88 : vector<2x8x8xf32>
    %90 = arith.truncf %89 : vector<2x8x8xf32> to vector<2x8x8xbf16>
    "tpu.trace_start"() <{level = 10 : i32, message = "bqk,bkd->bqd"}> : () -> ()
    %cst_35 = arith.constant dense<0.000000e+00> : vector<2x8x8xf32>
    %91 = tpu.matmul %90, %71, %cst_35 {dimension_numbers = #tpu.dot_dimension_numbers<[2], [1], [1], [2], [0, 0, 0, 1, 1, 2], [0], [0]>} : vector<2x8x8xbf16>, vector<2x8x8xbf16>, vector<2x8x8xf32> -> vector<2x8x8xf32>
    "tpu.trace_stop"() : () -> ()
    %92 = vector.extract_strided_slice %35 {offsets = [0, 0, 16], sizes = [2, 8, 8], strides = [1, 1, 1]} : vector<2x8x32xbf16> to vector<2x8x8xbf16>
    %93 = vector.extract_strided_slice %40 {offsets = [0, 0, 16], sizes = [2, 8, 8], strides = [1, 1, 1]} : vector<2x8x32xbf16> to vector<2x8x8xbf16>
    %94 = vector.extract_strided_slice %45 {offsets = [0, 0, 16], sizes = [2, 8, 8], strides = [1, 1, 1]} : vector<2x8x32xbf16> to vector<2x8x8xbf16>
    "tpu.trace_start"() <{level = 10 : i32, message = "bqd,bkd->bqk"}> : () -> ()
    %cst_36 = arith.constant dense<0.000000e+00> : vector<2x8x8xf32>
    %95 = tpu.matmul %92, %93, %cst_36 {dimension_numbers = #tpu.dot_dimension_numbers<[2], [2], [1], [1], [0, 0, 0, 1, 1, 1], [0], [0]>} : vector<2x8x8xbf16>, vector<2x8x8xbf16>, vector<2x8x8xf32> -> vector<2x8x8xf32>
    "tpu.trace_stop"() : () -> ()
    %c2 = arith.constant 2 : index
    %c0_37 = arith.constant 0 : index
    %c0_38 = arith.constant 0 : index
    %96 = vector.load %arg3[%c2, %c0_37, %c0_38] : memref<4x8x8xf32, #tpu.memory_space<vmem>>, vector<1x8x8xf32>
    %97 = vector.shape_cast %96 : vector<1x8x8xf32> to vector<8x8xf32>
    %98 = vector.shape_cast %97 : vector<8x8xf32> to vector<1x8x8xf32>
    %99 = vector.broadcast %98 : vector<1x8x8xf32> to vector<2x8x8xf32>
    %100 = arith.addf %95, %99 : vector<2x8x8xf32>
    %101 = vector.broadcast %15 : vector<2x1x8xf32> to vector<2x8x8xf32>
    %102 = arith.addf %100, %101 : vector<2x8x8xf32>
    %cst_39 = arith.constant dense<0xFF800000> : vector<2x8xf32>
    %103 = vector.multi_reduction <maximumf>, %102, %cst_39 [2] : vector<2x8x8xf32> to vector<2x8xf32>
    %104 = vector.shape_cast %103 : vector<2x8xf32> to vector<2x8x1xf32>
    %105 = vector.broadcast %104 : vector<2x8x1xf32> to vector<2x8x8xf32>
    %106 = arith.subf %102, %105 : vector<2x8x8xf32>
    %107 = math.exp %106 : vector<2x8x8xf32>
    %cst_40 = arith.constant dense<0.000000e+00> : vector<2x8xf32>
    %108 = vector.multi_reduction <add>, %107, %cst_40 [2] : vector<2x8x8xf32> to vector<2x8xf32>
    %109 = vector.shape_cast %108 : vector<2x8xf32> to vector<2x8x1xf32>
    %110 = tpu.reciprocal %109 {approx = true} : vector<2x8x1xf32> -> vector<2x8x1xf32>
    %111 = vector.broadcast %110 : vector<2x8x1xf32> to vector<2x8x8xf32>
    %112 = arith.mulf %107, %111 : vector<2x8x8xf32>
    %113 = arith.truncf %112 : vector<2x8x8xf32> to vector<2x8x8xbf16>
    "tpu.trace_start"() <{level = 10 : i32, message = "bqk,bkd->bqd"}> : () -> ()
    %cst_41 = arith.constant dense<0.000000e+00> : vector<2x8x8xf32>
    %114 = tpu.matmul %113, %94, %cst_41 {dimension_numbers = #tpu.dot_dimension_numbers<[2], [1], [1], [2], [0, 0, 0, 1, 1, 2], [0], [0]>} : vector<2x8x8xbf16>, vector<2x8x8xbf16>, vector<2x8x8xf32> -> vector<2x8x8xf32>
    "tpu.trace_stop"() : () -> ()
    %115 = vector.extract_strided_slice %35 {offsets = [0, 0, 24], sizes = [2, 8, 8], strides = [1, 1, 1]} : vector<2x8x32xbf16> to vector<2x8x8xbf16>
    %116 = vector.extract_strided_slice %40 {offsets = [0, 0, 24], sizes = [2, 8, 8], strides = [1, 1, 1]} : vector<2x8x32xbf16> to vector<2x8x8xbf16>
    %117 = vector.extract_strided_slice %45 {offsets = [0, 0, 24], sizes = [2, 8, 8], strides = [1, 1, 1]} : vector<2x8x32xbf16> to vector<2x8x8xbf16>
    "tpu.trace_start"() <{level = 10 : i32, message = "bqd,bkd->bqk"}> : () -> ()
    %cst_42 = arith.constant dense<0.000000e+00> : vector<2x8x8xf32>
    %118 = tpu.matmul %115, %116, %cst_42 {dimension_numbers = #tpu.dot_dimension_numbers<[2], [2], [1], [1], [0, 0, 0, 1, 1, 1], [0], [0]>} : vector<2x8x8xbf16>, vector<2x8x8xbf16>, vector<2x8x8xf32> -> vector<2x8x8xf32>
    "tpu.trace_stop"() : () -> ()
    %c3 = arith.constant 3 : index
    %c0_43 = arith.constant 0 : index
    %c0_44 = arith.constant 0 : index
    %119 = vector.load %arg3[%c3, %c0_43, %c0_44] : memref<4x8x8xf32, #tpu.memory_space<vmem>>, vector<1x8x8xf32>
    %120 = vector.shape_cast %119 : vector<1x8x8xf32> to vector<8x8xf32>
    %121 = vector.shape_cast %120 : vector<8x8xf32> to vector<1x8x8xf32>
    %122 = vector.broadcast %121 : vector<1x8x8xf32> to vector<2x8x8xf32>
    %123 = arith.addf %118, %122 : vector<2x8x8xf32>
    %124 = vector.broadcast %15 : vector<2x1x8xf32> to vector<2x8x8xf32>
    %125 = arith.addf %123, %124 : vector<2x8x8xf32>
    %cst_45 = arith.constant dense<0xFF800000> : vector<2x8xf32>
    %126 = vector.multi_reduction <maximumf>, %125, %cst_45 [2] : vector<2x8x8xf32> to vector<2x8xf32>
    %127 = vector.shape_cast %126 : vector<2x8xf32> to vector<2x8x1xf32>
    %128 = vector.broadcast %127 : vector<2x8x1xf32> to vector<2x8x8xf32>
    %129 = arith.subf %125, %128 : vector<2x8x8xf32>
    %130 = math.exp %129 : vector<2x8x8xf32>
    %cst_46 = arith.constant dense<0.000000e+00> : vector<2x8xf32>
    %131 = vector.multi_reduction <add>, %130, %cst_46 [2] : vector<2x8x8xf32> to vector<2x8xf32>
    %132 = vector.shape_cast %131 : vector<2x8xf32> to vector<2x8x1xf32>
    %133 = tpu.reciprocal %132 {approx = true} : vector<2x8x1xf32> -> vector<2x8x1xf32>
    %134 = vector.broadcast %133 : vector<2x8x1xf32> to vector<2x8x8xf32>
    %135 = arith.mulf %130, %134 : vector<2x8x8xf32>
    %136 = arith.truncf %135 : vector<2x8x8xf32> to vector<2x8x8xbf16>
    "tpu.trace_start"() <{level = 10 : i32, message = "bqk,bkd->bqd"}> : () -> ()
    %cst_47 = arith.constant dense<0.000000e+00> : vector<2x8x8xf32>
    %137 = tpu.matmul %136, %117, %cst_47 {dimension_numbers = #tpu.dot_dimension_numbers<[2], [1], [1], [2], [0, 0, 0, 1, 1, 2], [0], [0]>} : vector<2x8x8xbf16>, vector<2x8x8xbf16>, vector<2x8x8xf32> -> vector<2x8x8xf32>
    "tpu.trace_stop"() : () -> ()
    %138 = tpu.concatenate %68, %91, %114, %137 in 2 : vector<2x8x8xf32>, vector<2x8x8xf32>, vector<2x8x8xf32>, vector<2x8x8xf32> -> vector<2x8x32xf32>
    %139 = vector.shape_cast %138 : vector<2x8x32xf32> to vector<16x32xf32>
    %140 = arith.truncf %139 : vector<16x32xf32> to vector<16x32xbf16>
    %c0_48 = arith.constant 0 : index
    %c0_49 = arith.constant 0 : index
    %c0_50 = arith.constant 0 : index
    %141 = vector.load %arg8[%c0_48, %c0_49, %c0_50] : memref<2x32x32xbf16, #tpu.memory_space<vmem>>, vector<1x32x32xbf16>
    %142 = vector.shape_cast %141 : vector<1x32x32xbf16> to vector<32x32xbf16>
    %cst_51 = arith.constant dense<0.000000e+00> : vector<16x32xf32>
    %143 = tpu.matmul %140, %142, %cst_51 {dimension_numbers = #tpu.dot_dimension_numbers<[1], [0], [0], [1], [0, 0, 1, 1], [], []>} : vector<16x32xbf16>, vector<32x32xbf16>, vector<16x32xf32> -> vector<16x32xf32>
    %144 = arith.addf %9, %143 : vector<16x32xf32>
    %c0_52 = arith.constant 0 : index
    %c0_53 = arith.constant 0 : index
    %c0_54 = arith.constant 0 : index
    %145 = vector.load %arg9[%c0_52, %c0_53, %c0_54] : memref<2x1x32xf32, #tpu.memory_space<vmem>>, vector<1x1x32xf32>
    %146 = vector.shape_cast %145 : vector<1x1x32xf32> to vector<1x32xf32>
    %147 = arith.mulf %144, %144 : vector<16x32xf32>
    %cst_55 = arith.constant dense<0.000000e+00> : vector<16xf32>
    %148 = vector.multi_reduction <add>, %147, %cst_55 [1] : vector<16x32xf32> to vector<16xf32>
    %149 = vector.shape_cast %148 : vector<16xf32> to vector<16x1xf32>
    %cst_56 = arith.constant 3.200000e+01 : f32
    %150 = vector.broadcast %cst_56 : f32 to vector<16x1xf32>
    %151 = arith.divf %149, %150 : vector<16x1xf32>
    %cst_57 = arith.constant 9.99999997E-7 : f32
    %152 = vector.broadcast %cst_57 : f32 to vector<16x1xf32>
    %153 = arith.addf %151, %152 : vector<16x1xf32>
    %154 = math.rsqrt %153 : vector<16x1xf32>
    %155 = vector.broadcast %154 : vector<16x1xf32> to vector<16x32xf32>
    %156 = arith.mulf %144, %155 : vector<16x32xf32>
    %157 = vector.broadcast %146 : vector<1x32xf32> to vector<16x32xf32>
    %158 = arith.mulf %156, %157 : vector<16x32xf32>
    %159 = arith.truncf %158 : vector<16x32xf32> to vector<16x32xbf16>
    %c0_58 = arith.constant 0 : index
    %c0_59 = arith.constant 0 : index
    %c0_60 = arith.constant 0 : index
    %160 = vector.load %arg10[%c0_58, %c0_59, %c0_60] : memref<2x32x64xbf16, #tpu.memory_space<vmem>>, vector<1x32x64xbf16>
    %161 = vector.shape_cast %160 : vector<1x32x64xbf16> to vector<32x64xbf16>
    %cst_61 = arith.constant dense<0.000000e+00> : vector<16x64xf32>
    %162 = tpu.matmul %159, %161, %cst_61 {dimension_numbers = #tpu.dot_dimension_numbers<[1], [0], [0], [1], [0, 0, 1, 1], [], []>} : vector<16x32xbf16>, vector<32x64xbf16>, vector<16x64xf32> -> vector<16x64xf32>
    %cst_62 = arith.constant 0.000000e+00 : f32
    %163 = vector.broadcast %cst_62 : f32 to vector<16x64xf32>
    %164 = arith.maximumf %162, %163 : vector<16x64xf32>
    %165 = arith.truncf %164 : vector<16x64xf32> to vector<16x64xbf16>
    %c0_63 = arith.constant 0 : index
    %c0_64 = arith.constant 0 : index
    %c0_65 = arith.constant 0 : index
    %166 = vector.load %arg11[%c0_63, %c0_64, %c0_65] : memref<2x64x32xbf16, #tpu.memory_space<vmem>>, vector<1x64x32xbf16>
    %167 = vector.shape_cast %166 : vector<1x64x32xbf16> to vector<64x32xbf16>
    %cst_66 = arith.constant dense<0.000000e+00> : vector<16x32xf32>
    %168 = tpu.matmul %165, %167, %cst_66 {dimension_numbers = #tpu.dot_dimension_numbers<[1], [0], [0], [1], [0, 0, 1, 1], [], []>} : vector<16x64xbf16>, vector<64x32xbf16>, vector<16x32xf32> -> vector<16x32xf32>
    %169 = arith.addf %144, %168 : vector<16x32xf32>
    %c1_67 = arith.constant 1 : index
    %c0_68 = arith.constant 0 : index
    %c0_69 = arith.constant 0 : index
    %170 = vector.load %arg4[%c1_67, %c0_68, %c0_69] : memref<2x1x32xf32, #tpu.memory_space<vmem>>, vector<1x1x32xf32>
    %171 = vector.shape_cast %170 : vector<1x1x32xf32> to vector<1x32xf32>
    %172 = arith.mulf %169, %169 : vector<16x32xf32>
    %cst_70 = arith.constant dense<0.000000e+00> : vector<16xf32>
    %173 = vector.multi_reduction <add>, %172, %cst_70 [1] : vector<16x32xf32> to vector<16xf32>
    %174 = vector.shape_cast %173 : vector<16xf32> to vector<16x1xf32>
    %cst_71 = arith.constant 3.200000e+01 : f32
    %175 = vector.broadcast %cst_71 : f32 to vector<16x1xf32>
    %176 = arith.divf %174, %175 : vector<16x1xf32>
    %cst_72 = arith.constant 9.99999997E-7 : f32
    %177 = vector.broadcast %cst_72 : f32 to vector<16x1xf32>
    %178 = arith.addf %176, %177 : vector<16x1xf32>
    %179 = math.rsqrt %178 : vector<16x1xf32>
    %180 = vector.broadcast %179 : vector<16x1xf32> to vector<16x32xf32>
    %181 = arith.mulf %169, %180 : vector<16x32xf32>
    %182 = vector.broadcast %171 : vector<1x32xf32> to vector<16x32xf32>
    %183 = arith.mulf %181, %182 : vector<16x32xf32>
    %184 = arith.truncf %183 : vector<16x32xf32> to vector<16x32xbf16>
    %c1_73 = arith.constant 1 : index
    %c0_74 = arith.constant 0 : index
    %c0_75 = arith.constant 0 : index
    %185 = vector.load %arg5[%c1_73, %c0_74, %c0_75] : memref<2x32x32xbf16, #tpu.memory_space<vmem>>, vector<1x32x32xbf16>
    %186 = vector.shape_cast %185 : vector<1x32x32xbf16> to vector<32x32xbf16>
    %cst_76 = arith.constant dense<0.000000e+00> : vector<16x32xf32>
    %187 = tpu.matmul %184, %186, %cst_76 {dimension_numbers = #tpu.dot_dimension_numbers<[1], [0], [0], [1], [0, 0, 1, 1], [], []>} : vector<16x32xbf16>, vector<32x32xbf16>, vector<16x32xf32> -> vector<16x32xf32>
    %188 = arith.truncf %187 : vector<16x32xf32> to vector<16x32xbf16>
    %189 = vector.shape_cast %188 : vector<16x32xbf16> to vector<2x8x32xbf16>
    %c1_77 = arith.constant 1 : index
    %c0_78 = arith.constant 0 : index
    %c0_79 = arith.constant 0 : index
    %190 = vector.load %arg6[%c1_77, %c0_78, %c0_79] : memref<2x32x32xbf16, #tpu.memory_space<vmem>>, vector<1x32x32xbf16>
    %191 = vector.shape_cast %190 : vector<1x32x32xbf16> to vector<32x32xbf16>
    %cst_80 = arith.constant dense<0.000000e+00> : vector<16x32xf32>
    %192 = tpu.matmul %184, %191, %cst_80 {dimension_numbers = #tpu.dot_dimension_numbers<[1], [0], [0], [1], [0, 0, 1, 1], [], []>} : vector<16x32xbf16>, vector<32x32xbf16>, vector<16x32xf32> -> vector<16x32xf32>
    %193 = arith.truncf %192 : vector<16x32xf32> to vector<16x32xbf16>
    %194 = vector.shape_cast %193 : vector<16x32xbf16> to vector<2x8x32xbf16>
    %c1_81 = arith.constant 1 : index
    %c0_82 = arith.constant 0 : index
    %c0_83 = arith.constant 0 : index
    %195 = vector.load %arg7[%c1_81, %c0_82, %c0_83] : memref<2x32x32xbf16, #tpu.memory_space<vmem>>, vector<1x32x32xbf16>
    %196 = vector.shape_cast %195 : vector<1x32x32xbf16> to vector<32x32xbf16>
    %cst_84 = arith.constant dense<0.000000e+00> : vector<16x32xf32>
    %197 = tpu.matmul %184, %196, %cst_84 {dimension_numbers = #tpu.dot_dimension_numbers<[1], [0], [0], [1], [0, 0, 1, 1], [], []>} : vector<16x32xbf16>, vector<32x32xbf16>, vector<16x32xf32> -> vector<16x32xf32>
    %198 = arith.truncf %197 : vector<16x32xf32> to vector<16x32xbf16>
    %199 = vector.shape_cast %198 : vector<16x32xbf16> to vector<2x8x32xbf16>
    %200 = vector.extract_strided_slice %189 {offsets = [0, 0, 0], sizes = [2, 8, 8], strides = [1, 1, 1]} : vector<2x8x32xbf16> to vector<2x8x8xbf16>
    %201 = vector.extract_strided_slice %194 {offsets = [0, 0, 0], sizes = [2, 8, 8], strides = [1, 1, 1]} : vector<2x8x32xbf16> to vector<2x8x8xbf16>
    %202 = vector.extract_strided_slice %199 {offsets = [0, 0, 0], sizes = [2, 8, 8], strides = [1, 1, 1]} : vector<2x8x32xbf16> to vector<2x8x8xbf16>
    "tpu.trace_start"() <{level = 10 : i32, message = "bqd,bkd->bqk"}> : () -> ()
    %cst_85 = arith.constant dense<0.000000e+00> : vector<2x8x8xf32>
    %203 = tpu.matmul %200, %201, %cst_85 {dimension_numbers = #tpu.dot_dimension_numbers<[2], [2], [1], [1], [0, 0, 0, 1, 1, 1], [0], [0]>} : vector<2x8x8xbf16>, vector<2x8x8xbf16>, vector<2x8x8xf32> -> vector<2x8x8xf32>
    "tpu.trace_stop"() : () -> ()
    %c0_86 = arith.constant 0 : index
    %c0_87 = arith.constant 0 : index
    %c0_88 = arith.constant 0 : index
    %204 = vector.load %arg3[%c0_86, %c0_87, %c0_88] : memref<4x8x8xf32, #tpu.memory_space<vmem>>, vector<1x8x8xf32>
    %205 = vector.shape_cast %204 : vector<1x8x8xf32> to vector<8x8xf32>
    %206 = vector.shape_cast %205 : vector<8x8xf32> to vector<1x8x8xf32>
    %207 = vector.broadcast %206 : vector<1x8x8xf32> to vector<2x8x8xf32>
    %208 = arith.addf %203, %207 : vector<2x8x8xf32>
    %209 = vector.broadcast %15 : vector<2x1x8xf32> to vector<2x8x8xf32>
    %210 = arith.addf %208, %209 : vector<2x8x8xf32>
    %cst_89 = arith.constant dense<0xFF800000> : vector<2x8xf32>
    %211 = vector.multi_reduction <maximumf>, %210, %cst_89 [2] : vector<2x8x8xf32> to vector<2x8xf32>
    %212 = vector.shape_cast %211 : vector<2x8xf32> to vector<2x8x1xf32>
    %213 = vector.broadcast %212 : vector<2x8x1xf32> to vector<2x8x8xf32>
    %214 = arith.subf %210, %213 : vector<2x8x8xf32>
    %215 = math.exp %214 : vector<2x8x8xf32>
    %cst_90 = arith.constant dense<0.000000e+00> : vector<2x8xf32>
    %216 = vector.multi_reduction <add>, %215, %cst_90 [2] : vector<2x8x8xf32> to vector<2x8xf32>
    %217 = vector.shape_cast %216 : vector<2x8xf32> to vector<2x8x1xf32>
    %218 = tpu.reciprocal %217 {approx = true} : vector<2x8x1xf32> -> vector<2x8x1xf32>
    %219 = vector.broadcast %218 : vector<2x8x1xf32> to vector<2x8x8xf32>
    %220 = arith.mulf %215, %219 : vector<2x8x8xf32>
    %221 = arith.truncf %220 : vector<2x8x8xf32> to vector<2x8x8xbf16>
    "tpu.trace_start"() <{level = 10 : i32, message = "bqk,bkd->bqd"}> : () -> ()
    %cst_91 = arith.constant dense<0.000000e+00> : vector<2x8x8xf32>
    %222 = tpu.matmul %221, %202, %cst_91 {dimension_numbers = #tpu.dot_dimension_numbers<[2], [1], [1], [2], [0, 0, 0, 1, 1, 2], [0], [0]>} : vector<2x8x8xbf16>, vector<2x8x8xbf16>, vector<2x8x8xf32> -> vector<2x8x8xf32>
    "tpu.trace_stop"() : () -> ()
    %223 = vector.extract_strided_slice %189 {offsets = [0, 0, 8], sizes = [2, 8, 8], strides = [1, 1, 1]} : vector<2x8x32xbf16> to vector<2x8x8xbf16>
    %224 = vector.extract_strided_slice %194 {offsets = [0, 0, 8], sizes = [2, 8, 8], strides = [1, 1, 1]} : vector<2x8x32xbf16> to vector<2x8x8xbf16>
    %225 = vector.extract_strided_slice %199 {offsets = [0, 0, 8], sizes = [2, 8, 8], strides = [1, 1, 1]} : vector<2x8x32xbf16> to vector<2x8x8xbf16>
    "tpu.trace_start"() <{level = 10 : i32, message = "bqd,bkd->bqk"}> : () -> ()
    %cst_92 = arith.constant dense<0.000000e+00> : vector<2x8x8xf32>
    %226 = tpu.matmul %223, %224, %cst_92 {dimension_numbers = #tpu.dot_dimension_numbers<[2], [2], [1], [1], [0, 0, 0, 1, 1, 1], [0], [0]>} : vector<2x8x8xbf16>, vector<2x8x8xbf16>, vector<2x8x8xf32> -> vector<2x8x8xf32>
    "tpu.trace_stop"() : () -> ()
    %c1_93 = arith.constant 1 : index
    %c0_94 = arith.constant 0 : index
    %c0_95 = arith.constant 0 : index
    %227 = vector.load %arg3[%c1_93, %c0_94, %c0_95] : memref<4x8x8xf32, #tpu.memory_space<vmem>>, vector<1x8x8xf32>
    %228 = vector.shape_cast %227 : vector<1x8x8xf32> to vector<8x8xf32>
    %229 = vector.shape_cast %228 : vector<8x8xf32> to vector<1x8x8xf32>
    %230 = vector.broadcast %229 : vector<1x8x8xf32> to vector<2x8x8xf32>
    %231 = arith.addf %226, %230 : vector<2x8x8xf32>
    %232 = vector.broadcast %15 : vector<2x1x8xf32> to vector<2x8x8xf32>
    %233 = arith.addf %231, %232 : vector<2x8x8xf32>
    %cst_96 = arith.constant dense<0xFF800000> : vector<2x8xf32>
    %234 = vector.multi_reduction <maximumf>, %233, %cst_96 [2] : vector<2x8x8xf32> to vector<2x8xf32>
    %235 = vector.shape_cast %234 : vector<2x8xf32> to vector<2x8x1xf32>
    %236 = vector.broadcast %235 : vector<2x8x1xf32> to vector<2x8x8xf32>
    %237 = arith.subf %233, %236 : vector<2x8x8xf32>
    %238 = math.exp %237 : vector<2x8x8xf32>
    %cst_97 = arith.constant dense<0.000000e+00> : vector<2x8xf32>
    %239 = vector.multi_reduction <add>, %238, %cst_97 [2] : vector<2x8x8xf32> to vector<2x8xf32>
    %240 = vector.shape_cast %239 : vector<2x8xf32> to vector<2x8x1xf32>
    %241 = tpu.reciprocal %240 {approx = true} : vector<2x8x1xf32> -> vector<2x8x1xf32>
    %242 = vector.broadcast %241 : vector<2x8x1xf32> to vector<2x8x8xf32>
    %243 = arith.mulf %238, %242 : vector<2x8x8xf32>
    %244 = arith.truncf %243 : vector<2x8x8xf32> to vector<2x8x8xbf16>
    "tpu.trace_start"() <{level = 10 : i32, message = "bqk,bkd->bqd"}> : () -> ()
    %cst_98 = arith.constant dense<0.000000e+00> : vector<2x8x8xf32>
    %245 = tpu.matmul %244, %225, %cst_98 {dimension_numbers = #tpu.dot_dimension_numbers<[2], [1], [1], [2], [0, 0, 0, 1, 1, 2], [0], [0]>} : vector<2x8x8xbf16>, vector<2x8x8xbf16>, vector<2x8x8xf32> -> vector<2x8x8xf32>
    "tpu.trace_stop"() : () -> ()
    %246 = vector.extract_strided_slice %189 {offsets = [0, 0, 16], sizes = [2, 8, 8], strides = [1, 1, 1]} : vector<2x8x32xbf16> to vector<2x8x8xbf16>
    %247 = vector.extract_strided_slice %194 {offsets = [0, 0, 16], sizes = [2, 8, 8], strides = [1, 1, 1]} : vector<2x8x32xbf16> to vector<2x8x8xbf16>
    %248 = vector.extract_strided_slice %199 {offsets = [0, 0, 16], sizes = [2, 8, 8], strides = [1, 1, 1]} : vector<2x8x32xbf16> to vector<2x8x8xbf16>
    "tpu.trace_start"() <{level = 10 : i32, message = "bqd,bkd->bqk"}> : () -> ()
    %cst_99 = arith.constant dense<0.000000e+00> : vector<2x8x8xf32>
    %249 = tpu.matmul %246, %247, %cst_99 {dimension_numbers = #tpu.dot_dimension_numbers<[2], [2], [1], [1], [0, 0, 0, 1, 1, 1], [0], [0]>} : vector<2x8x8xbf16>, vector<2x8x8xbf16>, vector<2x8x8xf32> -> vector<2x8x8xf32>
    "tpu.trace_stop"() : () -> ()
    %c2_100 = arith.constant 2 : index
    %c0_101 = arith.constant 0 : index
    %c0_102 = arith.constant 0 : index
    %250 = vector.load %arg3[%c2_100, %c0_101, %c0_102] : memref<4x8x8xf32, #tpu.memory_space<vmem>>, vector<1x8x8xf32>
    %251 = vector.shape_cast %250 : vector<1x8x8xf32> to vector<8x8xf32>
    %252 = vector.shape_cast %251 : vector<8x8xf32> to vector<1x8x8xf32>
    %253 = vector.broadcast %252 : vector<1x8x8xf32> to vector<2x8x8xf32>
    %254 = arith.addf %249, %253 : vector<2x8x8xf32>
    %255 = vector.broadcast %15 : vector<2x1x8xf32> to vector<2x8x8xf32>
    %256 = arith.addf %254, %255 : vector<2x8x8xf32>
    %cst_103 = arith.constant dense<0xFF800000> : vector<2x8xf32>
    %257 = vector.multi_reduction <maximumf>, %256, %cst_103 [2] : vector<2x8x8xf32> to vector<2x8xf32>
    %258 = vector.shape_cast %257 : vector<2x8xf32> to vector<2x8x1xf32>
    %259 = vector.broadcast %258 : vector<2x8x1xf32> to vector<2x8x8xf32>
    %260 = arith.subf %256, %259 : vector<2x8x8xf32>
    %261 = math.exp %260 : vector<2x8x8xf32>
    %cst_104 = arith.constant dense<0.000000e+00> : vector<2x8xf32>
    %262 = vector.multi_reduction <add>, %261, %cst_104 [2] : vector<2x8x8xf32> to vector<2x8xf32>
    %263 = vector.shape_cast %262 : vector<2x8xf32> to vector<2x8x1xf32>
    %264 = tpu.reciprocal %263 {approx = true} : vector<2x8x1xf32> -> vector<2x8x1xf32>
    %265 = vector.broadcast %264 : vector<2x8x1xf32> to vector<2x8x8xf32>
    %266 = arith.mulf %261, %265 : vector<2x8x8xf32>
    %267 = arith.truncf %266 : vector<2x8x8xf32> to vector<2x8x8xbf16>
    "tpu.trace_start"() <{level = 10 : i32, message = "bqk,bkd->bqd"}> : () -> ()
    %cst_105 = arith.constant dense<0.000000e+00> : vector<2x8x8xf32>
    %268 = tpu.matmul %267, %248, %cst_105 {dimension_numbers = #tpu.dot_dimension_numbers<[2], [1], [1], [2], [0, 0, 0, 1, 1, 2], [0], [0]>} : vector<2x8x8xbf16>, vector<2x8x8xbf16>, vector<2x8x8xf32> -> vector<2x8x8xf32>
    "tpu.trace_stop"() : () -> ()
    %269 = vector.extract_strided_slice %189 {offsets = [0, 0, 24], sizes = [2, 8, 8], strides = [1, 1, 1]} : vector<2x8x32xbf16> to vector<2x8x8xbf16>
    %270 = vector.extract_strided_slice %194 {offsets = [0, 0, 24], sizes = [2, 8, 8], strides = [1, 1, 1]} : vector<2x8x32xbf16> to vector<2x8x8xbf16>
    %271 = vector.extract_strided_slice %199 {offsets = [0, 0, 24], sizes = [2, 8, 8], strides = [1, 1, 1]} : vector<2x8x32xbf16> to vector<2x8x8xbf16>
    "tpu.trace_start"() <{level = 10 : i32, message = "bqd,bkd->bqk"}> : () -> ()
    %cst_106 = arith.constant dense<0.000000e+00> : vector<2x8x8xf32>
    %272 = tpu.matmul %269, %270, %cst_106 {dimension_numbers = #tpu.dot_dimension_numbers<[2], [2], [1], [1], [0, 0, 0, 1, 1, 1], [0], [0]>} : vector<2x8x8xbf16>, vector<2x8x8xbf16>, vector<2x8x8xf32> -> vector<2x8x8xf32>
    "tpu.trace_stop"() : () -> ()
    %c3_107 = arith.constant 3 : index
    %c0_108 = arith.constant 0 : index
    %c0_109 = arith.constant 0 : index
    %273 = vector.load %arg3[%c3_107, %c0_108, %c0_109] : memref<4x8x8xf32, #tpu.memory_space<vmem>>, vector<1x8x8xf32>
    %274 = vector.shape_cast %273 : vector<1x8x8xf32> to vector<8x8xf32>
    %275 = vector.shape_cast %274 : vector<8x8xf32> to vector<1x8x8xf32>
    %276 = vector.broadcast %275 : vector<1x8x8xf32> to vector<2x8x8xf32>
    %277 = arith.addf %272, %276 : vector<2x8x8xf32>
    %278 = vector.broadcast %15 : vector<2x1x8xf32> to vector<2x8x8xf32>
    %279 = arith.addf %277, %278 : vector<2x8x8xf32>
    %cst_110 = arith.constant dense<0xFF800000> : vector<2x8xf32>
    %280 = vector.multi_reduction <maximumf>, %279, %cst_110 [2] : vector<2x8x8xf32> to vector<2x8xf32>
    %281 = vector.shape_cast %280 : vector<2x8xf32> to vector<2x8x1xf32>
    %282 = vector.broadcast %281 : vector<2x8x1xf32> to vector<2x8x8xf32>
    %283 = arith.subf %279, %282 : vector<2x8x8xf32>
    %284 = math.exp %283 : vector<2x8x8xf32>
    %cst_111 = arith.constant dense<0.000000e+00> : vector<2x8xf32>
    %285 = vector.multi_reduction <add>, %284, %cst_111 [2] : vector<2x8x8xf32> to vector<2x8xf32>
    %286 = vector.shape_cast %285 : vector<2x8xf32> to vector<2x8x1xf32>
    %287 = tpu.reciprocal %286 {approx = true} : vector<2x8x1xf32> -> vector<2x8x1xf32>
    %288 = vector.broadcast %287 : vector<2x8x1xf32> to vector<2x8x8xf32>
    %289 = arith.mulf %284, %288 : vector<2x8x8xf32>
    %290 = arith.truncf %289 : vector<2x8x8xf32> to vector<2x8x8xbf16>
    "tpu.trace_start"() <{level = 10 : i32, message = "bqk,bkd->bqd"}> : () -> ()
    %cst_112 = arith.constant dense<0.000000e+00> : vector<2x8x8xf32>
    %291 = tpu.matmul %290, %271, %cst_112 {dimension_numbers = #tpu.dot_dimension_numbers<[2], [1], [1], [2], [0, 0, 0, 1, 1, 2], [0], [0]>} : vector<2x8x8xbf16>, vector<2x8x8xbf16>, vector<2x8x8xf32> -> vector<2x8x8xf32>
    "tpu.trace_stop"() : () -> ()
    %292 = tpu.concatenate %222, %245, %268, %291 in 2 : vector<2x8x8xf32>, vector<2x8x8xf32>, vector<2x8x8xf32>, vector<2x8x8xf32> -> vector<2x8x32xf32>
    %293 = vector.shape_cast %292 : vector<2x8x32xf32> to vector<16x32xf32>
    %294 = arith.truncf %293 : vector<16x32xf32> to vector<16x32xbf16>
    %c1_113 = arith.constant 1 : index
    %c0_114 = arith.constant 0 : index
    %c0_115 = arith.constant 0 : index
    %295 = vector.load %arg8[%c1_113, %c0_114, %c0_115] : memref<2x32x32xbf16, #tpu.memory_space<vmem>>, vector<1x32x32xbf16>
    %296 = vector.shape_cast %295 : vector<1x32x32xbf16> to vector<32x32xbf16>
    %cst_116 = arith.constant dense<0.000000e+00> : vector<16x32xf32>
    %297 = tpu.matmul %294, %296, %cst_116 {dimension_numbers = #tpu.dot_dimension_numbers<[1], [0], [0], [1], [0, 0, 1, 1], [], []>} : vector<16x32xbf16>, vector<32x32xbf16>, vector<16x32xf32> -> vector<16x32xf32>
    %298 = arith.addf %169, %297 : vector<16x32xf32>
    %c1_117 = arith.constant 1 : index
    %c0_118 = arith.constant 0 : index
    %c0_119 = arith.constant 0 : index
    %299 = vector.load %arg9[%c1_117, %c0_118, %c0_119] : memref<2x1x32xf32, #tpu.memory_space<vmem>>, vector<1x1x32xf32>
    %300 = vector.shape_cast %299 : vector<1x1x32xf32> to vector<1x32xf32>
    %301 = arith.mulf %298, %298 : vector<16x32xf32>
    %cst_120 = arith.constant dense<0.000000e+00> : vector<16xf32>
    %302 = vector.multi_reduction <add>, %301, %cst_120 [1] : vector<16x32xf32> to vector<16xf32>
    %303 = vector.shape_cast %302 : vector<16xf32> to vector<16x1xf32>
    %cst_121 = arith.constant 3.200000e+01 : f32
    %304 = vector.broadcast %cst_121 : f32 to vector<16x1xf32>
    %305 = arith.divf %303, %304 : vector<16x1xf32>
    %cst_122 = arith.constant 9.99999997E-7 : f32
    %306 = vector.broadcast %cst_122 : f32 to vector<16x1xf32>
    %307 = arith.addf %305, %306 : vector<16x1xf32>
    %308 = math.rsqrt %307 : vector<16x1xf32>
    %309 = vector.broadcast %308 : vector<16x1xf32> to vector<16x32xf32>
    %310 = arith.mulf %298, %309 : vector<16x32xf32>
    %311 = vector.broadcast %300 : vector<1x32xf32> to vector<16x32xf32>
    %312 = arith.mulf %310, %311 : vector<16x32xf32>
    %313 = arith.truncf %312 : vector<16x32xf32> to vector<16x32xbf16>
    %c1_123 = arith.constant 1 : index
    %c0_124 = arith.constant 0 : index
    %c0_125 = arith.constant 0 : index
    %314 = vector.load %arg10[%c1_123, %c0_124, %c0_125] : memref<2x32x64xbf16, #tpu.memory_space<vmem>>, vector<1x32x64xbf16>
    %315 = vector.shape_cast %314 : vector<1x32x64xbf16> to vector<32x64xbf16>
    %cst_126 = arith.constant dense<0.000000e+00> : vector<16x64xf32>
    %316 = tpu.matmul %313, %315, %cst_126 {dimension_numbers = #tpu.dot_dimension_numbers<[1], [0], [0], [1], [0, 0, 1, 1], [], []>} : vector<16x32xbf16>, vector<32x64xbf16>, vector<16x64xf32> -> vector<16x64xf32>
    %cst_127 = arith.constant 0.000000e+00 : f32
    %317 = vector.broadcast %cst_127 : f32 to vector<16x64xf32>
    %318 = arith.maximumf %316, %317 : vector<16x64xf32>
    %319 = arith.truncf %318 : vector<16x64xf32> to vector<16x64xbf16>
    %c1_128 = arith.constant 1 : index
    %c0_129 = arith.constant 0 : index
    %c0_130 = arith.constant 0 : index
    %320 = vector.load %arg11[%c1_128, %c0_129, %c0_130] : memref<2x64x32xbf16, #tpu.memory_space<vmem>>, vector<1x64x32xbf16>
    %321 = vector.shape_cast %320 : vector<1x64x32xbf16> to vector<64x32xbf16>
    %cst_131 = arith.constant dense<0.000000e+00> : vector<16x32xf32>
    %322 = tpu.matmul %319, %321, %cst_131 {dimension_numbers = #tpu.dot_dimension_numbers<[1], [0], [0], [1], [0, 0, 1, 1], [], []>} : vector<16x64xbf16>, vector<64x32xbf16>, vector<16x32xf32> -> vector<16x32xf32>
    %323 = arith.addf %298, %322 : vector<16x32xf32>
    %c0_132 = arith.constant 0 : index
    %c0_133 = arith.constant 0 : index
    %324 = vector.load %arg12[%c0_132, %c0_133] : memref<1x32xf32, #tpu.memory_space<vmem>>, vector<1x32xf32>
    %325 = arith.mulf %323, %323 : vector<16x32xf32>
    %cst_134 = arith.constant dense<0.000000e+00> : vector<16xf32>
    %326 = vector.multi_reduction <add>, %325, %cst_134 [1] : vector<16x32xf32> to vector<16xf32>
    %327 = vector.shape_cast %326 : vector<16xf32> to vector<16x1xf32>
    %cst_135 = arith.constant 3.200000e+01 : f32
    %328 = vector.broadcast %cst_135 : f32 to vector<16x1xf32>
    %329 = arith.divf %327, %328 : vector<16x1xf32>
    %cst_136 = arith.constant 9.99999997E-7 : f32
    %330 = vector.broadcast %cst_136 : f32 to vector<16x1xf32>
    %331 = arith.addf %329, %330 : vector<16x1xf32>
    %332 = math.rsqrt %331 : vector<16x1xf32>
    %333 = vector.broadcast %332 : vector<16x1xf32> to vector<16x32xf32>
    %334 = arith.mulf %323, %333 : vector<16x32xf32>
    %335 = vector.broadcast %324 : vector<1x32xf32> to vector<16x32xf32>
    %336 = arith.mulf %334, %335 : vector<16x32xf32>
    %337 = arith.truncf %336 : vector<16x32xf32> to vector<16x32xbf16>
    %c0_137 = arith.constant 0 : index
    %c0_138 = arith.constant 0 : index
    %338 = vector.load %arg13[%c0_137, %c0_138] : memref<32x128xbf16, #tpu.memory_space<vmem>>, vector<32x128xbf16>
    %cst_139 = arith.constant dense<0.000000e+00> : vector<16x128xf32>
    %339 = tpu.matmul %337, %338, %cst_139 {dimension_numbers = #tpu.dot_dimension_numbers<[1], [0], [0], [1], [0, 0, 1, 1], [], []>} : vector<16x32xbf16>, vector<32x128xbf16>, vector<16x128xf32> -> vector<16x128xf32>
    %c0_140 = arith.constant 0 : index
    %c0_141 = arith.constant 0 : index
    %340 = vector.load %arg14[%c0_140, %c0_141] : memref<1x128xf32, #tpu.memory_space<vmem>>, vector<1x128xf32>
    %341 = vector.broadcast %340 : vector<1x128xf32> to vector<16x128xf32>
    %342 = arith.addf %339, %341 : vector<16x128xf32>
    %343 = vector.shape_cast %342 : vector<16x128xf32> to vector<2x8x128xf32>
    %c0_142 = arith.constant 0 : index
    %c0_143 = arith.constant 0 : index
    %c0_144 = arith.constant 0 : index
    %344 = vector.load %arg15[%c0_142, %c0_143, %c0_144] : memref<2x8x128xf32, #tpu.memory_space<vmem>>, vector<2x8x128xf32>
    tpu.vector_store %arg15[%c0_142, %c0_143, %c0_144], %343 {strides = array<i32>} : memref<2x8x128xf32, #tpu.memory_space<vmem>>, vector<2x8x128xf32>,
    return
  }
  func.func @transform_0(%arg0: i32) -> (i32, i32) {
    %c0_i32 = arith.constant 0 : i32
    %c0_i32_0 = arith.constant 0 : i32
    return %arg0, %c0_i32 : i32, i32
  }
  func.func @transform_1(%arg0: i32) -> (i32, i32) {
    %c0_i32 = arith.constant 0 : i32
    %c0_i32_0 = arith.constant 0 : i32
    %c0_i32_1 = arith.constant 0 : i32
    return %c0_i32, %c0_i32_0 : i32, i32
  }
  func.func @transform_2(%arg0: i32) -> (i32, i32, i32) {
    %c0_i32 = arith.constant 0 : i32
    %c0_i32_0 = arith.constant 0 : i32
    %c0_i32_1 = arith.constant 0 : i32
    %c0_i32_2 = arith.constant 0 : i32
    return %c0_i32, %c0_i32_0, %c0_i32_1 : i32, i32, i32
  }
  func.func @transform_3(%arg0: i32) -> (i32, i32, i32) {
    %c0_i32 = arith.constant 0 : i32
    %c0_i32_0 = arith.constant 0 : i32
    %c0_i32_1 = arith.constant 0 : i32
    %c0_i32_2 = arith.constant 0 : i32
    return %c0_i32, %c0_i32_0, %c0_i32_1 : i32, i32, i32
  }
  func.func @transform_4(%arg0: i32) -> (i32, i32, i32) {
    %c0_i32 = arith.constant 0 : i32
    %c0_i32_0 = arith.constant 0 : i32
    %c0_i32_1 = arith.constant 0 : i32
    %c0_i32_2 = arith.constant 0 : i32
    return %c0_i32, %c0_i32_0, %c0_i32_1 : i32, i32, i32
  }
  func.func @transform_5(%arg0: i32) -> (i32, i32, i32) {
    %c0_i32 = arith.constant 0 : i32
    %c0_i32_0 = arith.constant 0 : i32
    %c0_i32_1 = arith.constant 0 : i32
    %c0_i32_2 = arith.constant 0 : i32
    return %c0_i32, %c0_i32_0, %c0_i32_1 : i32, i32, i32
  }
  func.func @transform_6(%arg0: i32) -> (i32, i32, i32) {
    %c0_i32 = arith.constant 0 : i32
    %c0_i32_0 = arith.constant 0 : i32
    %c0_i32_1 = arith.constant 0 : i32
    %c0_i32_2 = arith.constant 0 : i32
    return %c0_i32, %c0_i32_0, %c0_i32_1 : i32, i32, i32
  }
  func.func @transform_7(%arg0: i32) -> (i32, i32, i32) {
    %c0_i32 = arith.constant 0 : i32
    %c0_i32_0 = arith.constant 0 : i32
    %c0_i32_1 = arith.constant 0 : i32
    %c0_i32_2 = arith.constant 0 : i32
    return %c0_i32, %c0_i32_0, %c0_i32_1 : i32, i32, i32
  }
  func.func @transform_8(%arg0: i32) -> (i32, i32, i32) {
    %c0_i32 = arith.constant 0 : i32
    %c0_i32_0 = arith.constant 0 : i32
    %c0_i32_1 = arith.constant 0 : i32
    %c0_i32_2 = arith.constant 0 : i32
    return %c0_i32, %c0_i32_0, %c0_i32_1 : i32, i32, i32
  }
  func.func @transform_9(%arg0: i32) -> (i32, i32, i32) {
    %c0_i32 = arith.constant 0 : i32
    %c0_i32_0 = arith.constant 0 : i32
    %c0_i32_1 = arith.constant 0 : i32
    %c0_i32_2 = arith.constant 0 : i32
    return %c0_i32, %c0_i32_0, %c0_i32_1 : i32, i32, i32
  }
  func.func @transform_10(%arg0: i32) -> (i32, i32, i32) {
    %c0_i32 = arith.constant 0 : i32
    %c0_i32_0 = arith.constant 0 : i32
    %c0_i32_1 = arith.constant 0 : i32
    %c0_i32_2 = arith.constant 0 : i32
    return %c0_i32, %c0_i32_0, %c0_i32_1 : i32, i32, i32
  }
  func.func @transform_11(%arg0: i32) -> (i32, i32) {
    %c0_i32 = arith.constant 0 : i32
    %c0_i32_0 = arith.constant 0 : i32
    %c0_i32_1 = arith.constant 0 : i32
    return %c0_i32, %c0_i32_0 : i32, i32
  }
  func.func @transform_12(%arg0: i32) -> (i32, i32) {
    %c0_i32 = arith.constant 0 : i32
    %c0_i32_0 = arith.constant 0 : i32
    %c0_i32_1 = arith.constant 0 : i32
    return %c0_i32, %c0_i32_0 : i32, i32
  }
  func.func @transform_13(%arg0: i32) -> (i32, i32) {
    %c0_i32 = arith.constant 0 : i32
    %c0_i32_0 = arith.constant 0 : i32
    %c0_i32_1 = arith.constant 0 : i32
    return %c0_i32, %c0_i32_0 : i32, i32
  }
  func.func @transform_14(%arg0: i32) -> (i32, i32, i32) {
    %c0_i32 = arith.constant 0 : i32
    %c0_i32_0 = arith.constant 0 : i32
    %c0_i32_1 = arith.constant 0 : i32
    return %arg0, %c0_i32, %c0_i32_0 : i32, i32, i32
  }
}

</mosaic_0001>

<bundles_post_ra>
// kernel: forward.1
= control target key start
LH: loop header
LB: loop body
LE: loop exit
PB: predicated region body
PF: predicated region fallthrough
CT: control target
= control target key end

     0   :  { %19 = vsyncpa [#allocation3], 0  ;;  %s3109_s0 = inlined_call_operand.vmem [shape: s32[2,8], index: 0, kind: input, shape index: {}]   ;;  %s3110_s1 = inlined_call_operand.hbm [shape: f32[22,32], index: 1, kind: input, shape index: {}]   ;;  %s3111_s2 = inlined_call_operand.vmem [shape: f32[4,8,8], index: 2, kind: input, shape index: {}]   ;;  %s3112_s3 = inlined_call_operand.hbm [shape: f32[2,1,32], index: 3, kind: input, shape index: {}]   ;;  %s3113_s4 = inlined_call_operand.vmem [shape: bf16[2,32,32], index: 4, kind: input, shape index: {}]   ;;  %s3114_s5 = inlined_call_operand.vmem [shape: bf16[2,32,32], index: 5, kind: input, shape index: {}]   ;;  %s3115_s6 = inlined_call_operand.hbm [shape: bf16[2,32,32], index: 6, kind: input, shape index: {}]   ;;  %s3116_s7 = inlined_call_operand.hbm [shape: bf16[2,32,32], index: 7, kind: input, shape index: {}]   ;;  %s3117_s8 = inlined_call_operand.hbm [shape: f32[2,1,32], index: 8, kind: input, shape index: {}]   ;;  %s3118_s9 = inlined_call_operand.hbm [shape: bf16[2,32,64], index: 9, kind: input, shape index: {}]   ;;  %s3119_s10 = inlined_call_operand.vmem [shape: bf16[2,64,32], index: 10, kind: input, shape index: {}]   ;;  %s3120_s11 = inlined_call_operand.vmem [shape: f32[1,32], index: 11, kind: input, shape index: {}]   ;;  %s3121_s12 = inlined_call_operand.hbm [shape: bf16[32,128], index: 12, kind: input, shape index: {}]   ;;  %s3122_s13 = inlined_call_operand.hbm [shape: f32[1,128], index: 13, kind: input, shape index: {}]   ;;  %s3123_s14 = inlined_call_operand.hbm [shape: f32[2,8,128], index: 14, kind: output, shape index: {}]  }
   0x1   :  { %20 = vsyncpa [#allocation6], 0 }
   0x2   :  { %21 = vsyncpa [#allocation9], 0 }
   0x3   :  { %22 = vsyncpa [#allocation12], 0 }
   0x4   :  { %23 = vsyncpa [#allocation15], 0  ;;  %s46_s15 = sshll.u32 %s3112_s3, 4  ;;  %s47_s15 = int_to_ptr.hbm [resolvable:$true] %s46_s15 }
   0x5   :  { %24 = vsyncpa [#allocation4], 0  ;;  %s2561_s16 = smov [#allocation5]   ;;  %s2562_s18 = smov 16  }
   0x6   :  { %s48_s17 = sshll.u32 %s2561_s16, 4  ;;  %s2563_s19 = smov 1   ;;  %s49_s17 = int_to_ptr.vmem [resolvable:$true] %s48_s17 }
   0x7   :  { %54 = dma.hbm_to_vmem [thread:$0]  %s47_s15, 32, %s49_s17, [#allocation6], %s2562_s18, %s2562_s18, %s2563_s19  }
   0x8   :  { %s76_s22 = sshll.u32 %s3116_s7, 4  ;;  %s2564_s23 = smov [#allocation8]   ;;  %s77_s22 = int_to_ptr.hbm [resolvable:$true] %s76_s22 }
   0x9   :  { %s78_s24 = sshll.u32 %s2564_s23, 4  ;;  %s102_s26 = sshll.u32 %s3118_s9, 4  ;;  %s79_s24 = int_to_ptr.vmem [resolvable:$true] %s78_s24  ;;  %s103_s26 = int_to_ptr.hbm [resolvable:$true] %s102_s26 }
   0xa   :  { %s2565_s27 = smov 64   ;;  %s2566_s28 = smov 4  }
   0xb   :  { %84 = dma.hbm_to_vmem [thread:$0]  %s77_s22, 512, %s79_s24, [#allocation9], %s2565_s27, %s2565_s27, %s2566_s28  }
   0xc   :  { %s31_s15 = sshll.u32 %s3110_s1, 4  ;;  %s2567_s7 = smov [#allocation11]   ;;  %s32_s15 = int_to_ptr.hbm [resolvable:$true] %s31_s15 }
   0xd   :  { %s104_s16 = sshll.u32 %s2567_s7, 4  ;;  %s2568_s9 = smov [#allocation2]   ;;  %s105_s16 = int_to_ptr.vmem [resolvable:$true] %s104_s16 }
   0xe   :  { %110 = dma.hbm_to_vmem [thread:$0]  %s103_s26, 512, %s105_s16, [#allocation12], %s2565_s27, %s2565_s27, %s2566_s28  }
   0xf   :  { %s33_s17 = sshll.u32 %s2568_s9, 4  ;;  %s2569_s20 = smov 128   ;;  %s34_s17 = int_to_ptr.vmem [resolvable:$true] %s33_s17 }
  0x10   :  { %s2570_s21 = smov 8   ;;  %s63_s1 = sshll.u32 %s3115_s6, 4  ;;  %s64_s1 = int_to_ptr.hbm [resolvable:$true] %s63_s1 }
  0x11   :  { %39 = dma.hbm_to_vmem [thread:$0]  %s32_s15, 384, %s34_s17, [#allocation3], %s2569_s20, %s2569_s20, %s2570_s21  }
  0x12   :  { %s2571_s24 = smov [#allocation7]   ;;  %s89_s26 = sshll.u32 %s3117_s8, 4  ;;  %s90_s26 = int_to_ptr.hbm [resolvable:$true] %s89_s26 }
  0x13   :  { %s65_s25 = sshll.u32 %s2571_s24, 4  ;;  %s2572_s30 = smov [#allocation10]   ;;  %s66_s25 = int_to_ptr.vmem [resolvable:$true] %s65_s25 }
  0x14   :  { %71 = dma.hbm_to_vmem [thread:$0]  %s64_s1, 512, %s66_s25, [#allocation6], %s2565_s27, %s2565_s27, %s2566_s28  }
  0x15   :  { %s91_s7 = sshll.u32 %s2572_s30, 4  ;;  %s119_s9 = sshll.u32 %s3121_s12, 4  ;;  %s92_s7 = int_to_ptr.vmem [resolvable:$true] %s91_s7  ;;  %s120_s9 = int_to_ptr.hbm [resolvable:$true] %s119_s9 }
  0x16   :  { %97 = dma.hbm_to_vmem [thread:$0]  %s90_s26, 32, %s92_s7, [#allocation9], %s2562_s18, %s2562_s18, %s2563_s19  }
  0x17   :  { %s133_s8 = sshll.u32 %s3122_s13, 4  ;;  %s2573_s22 = smov [#allocation13]   ;;  %s134_s8 = int_to_ptr.hbm [resolvable:$true] %s133_s8 }
  0x18   :  { %s121_s23 = sshll.u32 %s2573_s22, 4  ;;  %s2574_s1 = smov [#allocation14]   ;;  %s122_s23 = int_to_ptr.vmem [resolvable:$true] %s121_s23 }
  0x19   :  { %127 = dma.hbm_to_vmem [thread:$0]  %s120_s9, 256, %s122_s23, [#allocation12], %s2565_s27, %s2565_s27, %s2566_s28  }
  0x1a   :  { %s135_s12 = sshll.u32 %s2574_s1, 4  ;;  %s136_s12 = int_to_ptr.vmem [resolvable:$true] %s135_s12 }
  0x1b   :  { %138 = dma.hbm_to_vmem [thread:$0]  %s134_s8, 16, %s136_s12, [#allocation15]  }
  0x1c   :  { %2549 = dma.done.wait [#allocation3], 384  }
  0x1d   :  { %2550 = vsyncadd [#allocation3], 4294966912 }
  0x1e   :  { %2551 = dma.done.wait [#allocation6], 544  }
  0x1f   :  { %2552 = vsyncadd [#allocation6], 4294966752 }
  0x20   :  { %2553 = dma.done.wait [#allocation9], 544  }
  0x21   :  { %2554 = vsyncadd [#allocation9], 4294966752 }
  0x22   :  { %2555 = dma.done.wait [#allocation12], 768  }
  0x23   :  { %2556 = vsyncadd [#allocation12], 4294966528 }
  0x24   :  { %2557 = dma.done.wait [#allocation15], 16  }
  0x25   :  { %2558 = vsyncadd [#allocation15], 4294967280  ;;  %v174_v0 = vlaneseq  ;;  %vm205_vm0 = vcmask 1045504   ;;  %v2705_v2 = vld [vmem:[%s3109_s0] sm:$0x3]  ;;  %v196_v4 = vld [vmem:[#allocation2 + $0x8] sm:$0xff] }
  0x26   :  { %v197_v3 = vld [vmem:[#allocation2 + $0x10] sm:$0x3f]  ;;  %v173_v5 = vperm.slane %v2705_v2, 0  ;;  %v180_v6 = vperm.slane %v2705_v2, 1  ;;  %v195_v7 = vld [vmem:[#allocation2] sm:$0xff]  ;;  %vm198_vm1 = vcmask 179200  }
  0x27   :  { %v175_v1 = vshrl.u32 %v174_v0, 7  ;;  %1969 = vmatpush.msk.msra.mxu0 %vm205_vm0, %v197_v3  ;;  %v188_v8 = vand.u32 127, %v174_v0  ;;  %v2575_v10 = vmov 0.0   ;;  %vm239_vm4 = vcmask 261120   ;;  %v2160_v26 = vld [vmem:[%s3113_s4 + $0x8] sm:$0xff]  ;;  %v2159_v30 = vld [vmem:[%s3113_s4] sm:$0xff] }
  0x28   :  { %v2576_v20 = vmov 32.0   ;;  %v2162_v27 = vld [vmem:[%s3114_s5 + $0x8] sm:$0xff]  ;;  %310 = vmatpush.bf16.msra.mxu1 %v2160_v26  ;;  %v2161_v31 = vld [vmem:[%s3114_s5] sm:$0xff]  ;;  %v2241_v53 = vld [vmem:[#allocation5] ss:$0 sm:$0xff]  ;;  %vm385_vm12 = vcmask 64512  }
  0x29   :  { %2210 = vset.pattern.permute.xlu0 %v175_v1  ;;  %223 = vmatpush.msra.mxu0 %v196_v4  ;;  %2247 = vrcp.f32 %v2576_v20  ;;  %v2164_v28 = vld [vmem:[#allocation7 + $0x8] sm:$0xff]  ;;  %v2163_v32 = vld [vmem:[#allocation7] sm:$0xff]  ;;  %s2577_s30 = smov 120   ;;  %vm457_vm13 = vcmask 1043456   ;;  %s2578_s7 = smov 112   ;;  %vm232_vm14 = vcmp.eq.s32.totalorder %v2705_v2, 0 }
  0x2a   :  { %342 = vmatpush.bf16.msra.mxu2 %v2162_v27  ;;  %374 = vmatpush.bf16.msra.mxu3 %v2164_v28  ;;  %s2579_s15 = smov 104   ;;  %vm885_vm15 = vcmask 130048   ;;  %vm888_vm0 = vcmask 195584   ;;  %s1950_s0 = sshll.u32 %s3123_s14, 4  ;;  %s1951_s0 = int_to_ptr.hbm [resolvable:$true] %s1950_s0 }
  0x2b   :  { %224 = vmatpush.msra.mxu0 %v195_v7 }
  0x2c   :  { %311 = vmatpush.bf16.msra.mxu1 %v2159_v30 }
  0x2e   :  { %343 = vmatpush.bf16.msra.mxu2 %v2161_v31  ;;  %375 = vmatpush.bf16.msra.mxu3 %v2163_v32 }
  0x2f   :  { %v2248_v21 = vpop.eup %2247 }
  0x30   :  { %v247_v22 = vmul.f32 32.0, %v2248_v21  ;;  %vm251_vm5 = vweird.f32 %v2248_v21 }
  0x31   :  { %178 = vperm.xlu0 %2210, %v173_v5  }
  0x32   :  { %v248_v23 = vsub.f32 1.0, %v247_v22 }
  0x34   :  { %v249_v24 = vmul.f32 %v2248_v21, %v248_v23 }
  0x36   :  { %v250_v25 = vadd.f32 %v2248_v21, %v249_v24 }
  0x38   :  { %v2727_v29 = vsel %vm251_vm5, %v2248_v21, %v250_v25 }
  0x39   :  { %185 = vperm.xlu0 %2210, %v180_v6  }
  0xa3   :  { %v179_v9 = vpop.permute.xlu0 %178 }
  0xa4   :  { %vm189_vm2 = vcmp.eq.s32.totalorder %v179_v9, %v188_v8 }
  0xa5   :  { %v1967_v11 = vsel %vm189_vm2, 1.0, %v2575_v10 }
  0xa6   :  { %1970 = vmatmul.msk.f32.vlgmr.msra.gmra.mxu0 %vm198_vm1, %v1967_v11 }
  0xab   :  { %v186_v12 = vpop.permute.xlu0 %185 }
  0xac   :  { %vm190_vm3 = vcmp.eq.s32.totalorder %v186_v12, %v188_v8 }
  0xad   :  { %v1968_v13 = vsel %vm190_vm3, 1.0, %v2575_v10 }
  0xae   :  { %1971 = vmatmul.msk.f32.gmra.mxu0 %vm198_vm1, %v1968_v13 }
 0x123   :  { %v2711_v14 = vpop.f32.mrf.mxu0 }
 0x124   :  { %v237_v15 = vmul.f32 %v2711_v14, %v2711_v14 }
 0x126   :  { %v240_v16 = vsel %vm239_vm4, %v237_v15, 0.0 }
 0x127   :  { %241 = vadd.xlane.f32.xlu1 %v240_v16 }
 0x12b   :  { %v2716_v17 = vpop.f32.mrf.mxu0 }
 0x12c   :  { %v238_v18 = vmul.f32 %v2716_v17, %v2716_v17 }
 0x12e   :  { %v243_v19 = vsel %vm239_vm4, %v238_v18, 0.0 }
 0x12f   :  { %244 = vadd.xlane.f32.xlu1 %v243_v19 }
 0x19a   :  { %v242_v33 = vpop.xlane.xlu1 %241 }
 0x19b   :  { %v253_v34 = vmul.f32 %v2727_v29, %v242_v33 }
 0x19d   :  { %v255_v35 = vadd.f32 1e-06, %v253_v34 }
 0x19f   :  { %2249 = vrsqrt.f32 %v255_v35  ;;  %vm263_vm7 = vweird.f32 %v255_v35 }
 0x1a2   :  { %v245_v36 = vpop.xlane.xlu1 %244 }
 0x1a3   :  { %v254_v37 = vmul.f32 %v2727_v29, %v245_v36 }
 0x1a5   :  { %v2250_v38 = vpop.eup %2249  ;;  %v256_v39 = vadd.f32 1e-06, %v254_v37  ;;  %v233_v37 = vsel %vm232_vm14, -1e+09, %v2575_v10 }
 0x1a6   :  { %v258_v40 = vmul.f32 %v2250_v38, %v255_v35  ;;  %vm264_vm6 = vweird.f32 %v2250_v38 }
 0x1a7   :  { %2251 = vrsqrt.f32 %v256_v39  ;;  %vm265_vm8 = vmor %vm263_vm7, %vm264_vm6  ;;  %vm273_vm10 = vweird.f32 %v256_v39 }
 0x1a8   :  { %v259_v41 = vmul.f32 %v2250_v38, %v258_v40 }
 0x1aa   :  { %v260_v42 = vmul.f32 0.5, %v259_v41 }
 0x1ac   :  { %v261_v43 = vsub.f32 1.5, %v260_v42  ;;  %v235_v42 = vrot.slane %v233_v37, 1 }
 0x1ad   :  { %v2252_v44 = vpop.eup %2251 }
 0x1ae   :  { %v268_v45 = vmul.f32 %v2252_v44, %v256_v39  ;;  %v262_v46 = vmul.f32 %v2250_v38, %v261_v43  ;;  %vm274_vm9 = vweird.f32 %v2252_v44  ;;  %v2781_v39 = vperm.slane %v233_v37, 0 }
 0x1af   :  { %vm275_vm11 = vmor %vm273_vm10, %vm274_vm9 }
 0x1b0   :  { %v269_v47 = vmul.f32 %v2252_v44, %v268_v45  ;;  %v266_v49 = vsel %vm265_vm8, %v2250_v38, %v262_v46  ;;  %v2779_v38 = vld [vmem:[%s3111_s2] sm:$0xff]  ;;  %vm1036_vm8 = vcmask 523264  }
 0x1b1   :  { %v277_v52 = vmul.f32 %v266_v49, %v2711_v14 }
 0x1b2   :  { %v270_v48 = vmul.f32 0.5, %v269_v47 }
 0x1b3   :  { %v282_v56 = vmul.f32 %v2241_v53, %v277_v52 }
 0x1b4   :  { %v271_v50 = vsub.f32 1.5, %v270_v48 }
 0x1b6   :  { %v272_v51 = vmul.f32 %v2252_v44, %v271_v50 }
 0x1b8   :  { %v276_v54 = vsel %vm275_vm11, %v2252_v44, %v272_v51  ;;  %v2787_v44 = vperm.slane %v235_v42, 0 }
 0x1b9   :  { %v278_v55 = vmul.f32 %v276_v54, %v2716_v17 }
 0x1bb   :  { %v283_v57 = vmul.f32 %v2241_v53, %v278_v55  ;;  %v2798_v55 = vld [vmem:[%s3111_s2 + $0x8] sm:$0xff] }
 0x1bd   :  { %v284_v58 = vpack.c.bf16 %v283_v57, %v282_v56 }
 0x1bf   :  { %1980 = vmatmul.msk.bf16.vlgmr.msra.gmra.mxu1 %vm239_vm4, %v284_v58  ;;  %1989 = vmatmul.msk.bf16.vlgmr.msra.gmra.mxu2 %vm239_vm4, %v284_v58 }
 0x1c0   :  { %1998 = vmatmul.msk.bf16.vlgmr.msra.gmra.mxu3 %vm239_vm4, %v284_v58 }
 0x23c   :  { %v313_v59 = vpop.f32.mrf.mxu1 }
 0x23d   :  { %v318_v60 = vpack.c.bf16 %v313_v59, %v313_v59 }
 0x23f   :  { %v496_v61 = vunpack.c.l.b16 %v318_v60 }
 0x241   :  { %v497_v62 = vpack.c.b16 %v496_v61, %v496_v61 }
 0x242   :  { %v345_v63 = vpop.f32.mrf.mxu2 }
 0x243   :  { %v350_v0 = vpack.c.bf16 %v345_v63, %v345_v63  ;;  %v377_v1 = vpop.f32.mrf.mxu3  ;;  %498 = vrot.lane.b32.xlu0 %v497_v62, %s2577_s30 }
 0x244   :  { %v2743_v3 = vpack.c.bf16 %v377_v1, %v377_v1  ;;  %v315_v4 = vpop.f32.mrf.mxu1  ;;  %v2809_v1 = vld [vmem:[%s3111_s2 + $0x10] sm:$0xff] }
 0x245   :  { %v501_v5 = vunpack.c.l.b16 %v350_v0  ;;  %v319_v6 = vpack.c.bf16 %v315_v4, %v315_v4  ;;  %v390_v7 = vsel %vm385_vm12, %v350_v0, 0 }
 0x246   :  { %399 = vmatpush.bf16.xpose.msrb.mxu0 %v390_v7  ;;  %v459_v8 = vsel %vm457_vm13, %v2743_v3, 0 }
 0x247   :  { %v502_v9 = vpack.c.b16 %v501_v5, %v501_v5  ;;  %v525_v11 = vunpack.c.l.b16 %v319_v6  ;;  %468 = vmatpush.bf16.msrb.mxu2 %v459_v8 }
 0x249   :  { %v526_v12 = vpack.c.b16 %v525_v11, %v525_v11  ;;  %503 = vrot.lane.b32.xlu2 %v502_v9, %s2577_s30 }
 0x24a   :  { %v347_v13 = vpop.f32.mrf.mxu2 }
 0x24b   :  { %v351_v15 = vpack.c.bf16 %v347_v13, %v347_v13  ;;  %v379_v16 = vpop.f32.mrf.mxu3  ;;  %527 = vrot.lane.b32.xlu1 %v526_v12, %s2577_s30 }
 0x24c   :  { %v2750_v18 = vpack.c.bf16 %v379_v16, %v379_v16 }
 0x24d   :  { %v530_v19 = vunpack.c.l.b16 %v351_v15  ;;  %1999 = vmatmul.msk.bf16.vlgmr.msrb.gmra.mxu0 %vm385_vm12, %v318_v60  ;;  %v409_v20 = vsel %vm385_vm12, %v351_v15, 0 }
 0x24e   :  { %418 = vmatpush.bf16.xpose.msrb.mxu1 %v409_v20  ;;  %v478_v21 = vsel %vm457_vm13, %v2750_v18, 0 }
 0x24f   :  { %v531_v22 = vpack.c.b16 %v530_v19, %v530_v19  ;;  %487 = vmatpush.bf16.msrb.mxu3 %v478_v21 }
 0x251   :  { %532 = vrot.lane.b32.xlu2 %v531_v22, %s2577_s30  ;;  %654 = vrot.lane.b32.xlu0 %v531_v22, %s2578_s7 }
 0x253   :  { %768 = vrot.lane.b32.xlu1 %v526_v12, %s2579_s15 }
 0x255   :  { %2000 = vmatmul.msk.bf16.vlgmr.msrb.gmra.mxu1 %vm385_vm12, %v319_v6 }
 0x259   :  { %631 = vrot.lane.b32.xlu2 %v502_v9, %s2578_s7  ;;  %652 = vrot.lane.b32.xlu0 %v526_v12, %s2578_s7 }
 0x261   :  { %629 = vrot.lane.b32.xlu2 %v497_v62, %s2578_s7  ;;  %770 = vrot.lane.b32.xlu0 %v531_v22, %s2579_s15 }
 0x269   :  { %747 = vrot.lane.b32.xlu2 %v502_v9, %s2579_s15 }
 0x271   :  { %745 = vrot.lane.b32.xlu2 %v497_v62, %s2579_s15 }
 0x2a3   :  { %v504_v23 = vpop.permute.xlu2 %503 }
 0x2a4   :  { %v509_v24 = vsel %vm385_vm12, %v504_v23, 0 }
 0x2a5   :  { %518 = vmatpush.bf16.xpose.msra.mxu0 %v509_v24 }
 0x2ab   :  { %v533_v25 = vpop.permute.xlu2 %532 }
 0x2ac   :  { %v538_v26 = vsel %vm385_vm12, %v533_v25, 0 }
 0x2ad   :  { %547 = vmatpush.bf16.xpose.msra.mxu1 %v538_v26 }
 0x2b3   :  { %v632_v27 = vpop.permute.xlu2 %631 }
 0x2b4   :  { %v637_v28 = vsel %vm385_vm12, %v632_v27, 0  ;;  %v2820_v27 = vld [vmem:[%s3111_s2 + $0x18] sm:$0xff]  ;;  %s2580_s2 = smov 24  }
 0x2b5   :  { %v499_v30 = vpop.permute.xlu0 %498  ;;  %646 = vmatpush.bf16.xpose.msrb.mxu0 %v637_v28 }
 0x2b6   :  { %2004 = vmatmul.msk.bf16.vlgmr.msra.gmra.mxu0 %vm385_vm12, %v499_v30  ;;  %v604_v30 = vunpack.c.l.b16 %v2750_v18 }
 0x2bb   :  { %v630_v31 = vpop.permute.xlu2 %629 }
 0x2bd   :  { %v528_v32 = vpop.permute.xlu1 %527 }
 0x2be   :  { %2005 = vmatmul.msk.bf16.vlgmr.msra.gmra.mxu1 %vm385_vm12, %v528_v32 }
 0x2c3   :  { %v748_v33 = vpop.permute.xlu2 %747  ;;  %v655_v34 = vpop.permute.xlu0 %654 }
 0x2c4   :  { %v753_v35 = vsel %vm385_vm12, %v748_v33, 0  ;;  %v660_v36 = vsel %vm385_vm12, %v655_v34, 0  ;;  %v2826_v34 = vpack.c.b16 %v604_v30, %v604_v30 }
 0x2c5   :  { %762 = vmatpush.bf16.xpose.msra.mxu0 %v753_v35  ;;  %669 = vmatpush.bf16.xpose.msrb.mxu1 %v660_v36  ;;  %v769_v54 = vpop.permute.xlu1 %768 }
 0x2c6   :  { %2009 = vmatmul.msk.bf16.vlgmr.msrb.gmra.mxu0 %vm385_vm12, %v630_v31 }
 0x2ca   :  { %v401_v2 = vpop.f32.mrf.mxu0 }
 0x2cb   :  { %v402_v40 = vadd.f32 %v401_v2, %v2779_v38  ;;  %v653_v41 = vpop.permute.xlu0 %652  ;;  %v746_v50 = vpop.permute.xlu2 %745 }
 0x2cd   :  { %v428_v43 = vadd.f32 %v2781_v39, %v402_v40  ;;  %v580_v40 = vunpack.c.l.b16 %v2743_v3 }
 0x2ce   :  { %2010 = vmatmul.msk.bf16.vlgmr.msrb.gmra.mxu1 %vm385_vm12, %v653_v41 }
 0x2cf   :  { %v430_v10 = vsel %vm385_vm12, %v428_v43, -inf  ;;  %v2833_v41 = vpack.c.b16 %v580_v40, %v580_v40 }
 0x2d0   :  { %431 = vmax.xlane.f32.xlu0 %v430_v10 }
 0x2d2   :  { %v403_v45 = vpop.f32.mrf.mxu0  ;;  %v420_v46 = vpop.f32.mrf.mxu1 }
 0x2d3   :  { %v421_v47 = vadd.f32 %v420_v46, %v2779_v38  ;;  %v771_v48 = vpop.permute.xlu0 %770 }
 0x2d4   :  { %v776_v49 = vsel %vm385_vm12, %v771_v48, 0 }
 0x2d5   :  { %785 = vmatpush.bf16.xpose.msra.mxu1 %v776_v49  ;;  %v429_v51 = vadd.f32 %v2787_v44, %v421_v47 }
 0x2d6   :  { %2014 = vmatmul.msk.bf16.vlgmr.msra.gmra.mxu0 %vm385_vm12, %v746_v50 }
 0x2d7   :  { %v433_v52 = vsel %vm385_vm12, %v429_v51, -inf }
 0x2d8   :  { %434 = vmax.xlane.f32.xlu2 %v433_v52 }
 0x2da   :  { %v422_v53 = vpop.f32.mrf.mxu1 }
 0x2de   :  { %2015 = vmatmul.msk.bf16.vlgmr.msra.gmra.mxu1 %vm385_vm12, %v769_v54 }
 0x333   :  { %v520_v56 = vpop.f32.mrf.mxu0 }
 0x334   :  { %v521_v57 = vadd.f32 %v2798_v55, %v520_v56 }
 0x336   :  { %v553_v58 = vadd.f32 %v521_v57, %v2781_v39 }
 0x338   :  { %v555_v59 = vsel %vm385_vm12, %v553_v58, -inf }
 0x339   :  { %556 = vmax.xlane.f32.xlu1 %v555_v59 }
 0x33b   :  { %v522_v60 = vpop.f32.mrf.mxu0  ;;  %v549_v61 = vpop.f32.mrf.mxu1 }
 0x33c   :  { %v550_v62 = vadd.f32 %v2798_v55, %v549_v61 }
 0x33e   :  { %v554_v63 = vadd.f32 %v550_v62, %v2787_v44 }
 0x340   :  { %v558_v0 = vsel %vm385_vm12, %v554_v63, -inf }
 0x341   :  { %559 = vmax.xlane.f32.xlu2 %v558_v0 }
 0x343   :  { %v648_v4 = vpop.f32.mrf.mxu0  ;;  %v432_v5 = vpop.xlane.xlu0 %431 }
 0x344   :  { %v649_v6 = vadd.f32 %v2809_v1, %v648_v4  ;;  %v436_v7 = vsub.f32 %v428_v43, %v432_v5  ;;  %v551_v8 = vpop.f32.mrf.mxu1 }
 0x346   :  { %v438_v9 = vmul.f32 1.442695, %v436_v7  ;;  %v675_v11 = vadd.f32 %v649_v6, %v2781_v39 }
 0x348   :  { %2253 = vpow2.f32 %v438_v9  ;;  %v677_v12 = vsel %vm385_vm12, %v675_v11, -inf }
 0x349   :  { %678 = vmax.xlane.f32.xlu0 %v677_v12 }
 0x34b   :  { %v650_v13 = vpop.f32.mrf.mxu0  ;;  %v435_v15 = vpop.xlane.xlu2 %434 }
 0x34c   :  { %v671_v16 = vpop.f32.mrf.mxu1  ;;  %v437_v19 = vsub.f32 %v429_v51, %v435_v15 }
 0x34d   :  { %v672_v22 = vadd.f32 %v2809_v1, %v671_v16 }
 0x34e   :  { %v2254_v20 = vpop.eup %2253  ;;  %v440_v21 = vmul.f32 1.442695, %v437_v19 }
 0x34f   :  { %v442_v23 = vsel %vm385_vm12, %v2254_v20, 0.0  ;;  %v676_v25 = vadd.f32 %v672_v22, %v2787_v44 }
 0x350   :  { %2255 = vpow2.f32 %v440_v21  ;;  %443 = vadd.xlane.f32.xlu1 %v442_v23 }
 0x351   :  { %v680_v32 = vsel %vm385_vm12, %v676_v25, -inf }
 0x353   :  { %v764_v24 = vpop.f32.mrf.mxu0 }
 0x354   :  { %v673_v26 = vpop.f32.mrf.mxu1  ;;  %v765_v31 = vadd.f32 %v2820_v27, %v764_v24 }
 0x356   :  { %v2256_v28 = vpop.eup %2255  ;;  %v791_v36 = vadd.f32 %v765_v31, %v2781_v39 }
 0x357   :  { %v445_v33 = vsel %vm385_vm12, %v2256_v28, 0.0 }
 0x358   :  { %681 = vmax.xlane.f32.xlu1 %v680_v32  ;;  %446 = vadd.xlane.f32.xlu2 %v445_v33  ;;  %v793_v2 = vsel %vm385_vm12, %v791_v36, -inf }
 0x35b   :  { %v766_v35 = vpop.f32.mrf.mxu0 }
 0x35c   :  { %v787_v37 = vpop.f32.mrf.mxu1 }
 0x35d   :  { %606 = vrot.lane.b32.xlu0 %v2826_v34, %s2577_s30  ;;  %v788_v42 = vadd.f32 %v2820_v27, %v787_v37 }
 0x35f   :  { %v2841_v43 = vadd.f32 %v788_v42, %v2787_v44 }
 0x360   :  { %794 = vmax.xlane.f32.xlu2 %v793_v2 }
 0x361   :  { %v796_v10 = vsel %vm385_vm12, %v2841_v43, -inf }
 0x364   :  { %v789_v18 = vpop.f32.mrf.mxu1 }
 0x371   :  { %701 = vrot.lane.b32.xlu1 %v2833_v41, %s2578_s7 }
 0x378   :  { %582 = vrot.lane.b32.xlu2 %v2833_v41, %s2577_s30 }
 0x387   :  { %797 = vmax.xlane.f32.xlu0 %v796_v10 }
 0x3ac   :  { %v557_v45 = vpop.xlane.xlu1 %556 }
 0x3ad   :  { %v561_v46 = vsub.f32 %v553_v58, %v557_v45 }
 0x3af   :  { %v563_v3 = vmul.f32 1.442695, %v561_v46 }
 0x3b1   :  { %2257 = vpow2.f32 %v563_v3 }
 0x3b4   :  { %v560_v47 = vpop.xlane.xlu2 %559 }
 0x3b5   :  { %v562_v48 = vsub.f32 %v554_v63, %v560_v47 }
 0x3b7   :  { %v2845_v49 = vpop.eup %2257  ;;  %v565_v50 = vmul.f32 1.442695, %v562_v48 }
 0x3b8   :  { %v567_v51 = vsel %vm385_vm12, %v2845_v49, 0.0 }
 0x3b9   :  { %2259 = vpow2.f32 %v565_v50  ;;  %568 = vadd.xlane.f32.xlu0 %v567_v51 }
 0x3bc   :  { %v679_v52 = vpop.xlane.xlu0 %678 }
 0x3bd   :  { %v683_v53 = vsub.f32 %v675_v11, %v679_v52 }
 0x3bf   :  { %v2260_v54 = vpop.eup %2259  ;;  %v685_v56 = vmul.f32 1.442695, %v683_v53 }
 0x3c0   :  { %v570_v57 = vsel %vm385_vm12, %v2260_v54, 0.0 }
 0x3c1   :  { %2261 = vpow2.f32 %v685_v56  ;;  %571 = vadd.xlane.f32.xlu1 %v570_v57 }
 0x3c3   :  { %v444_v58 = vpop.xlane.xlu1 %443 }
 0x3c4   :  { %2263 = vrcp.f32 %v444_v58 }
 0x3c7   :  { %v2850_v59 = vpop.eup %2261 }
 0x3c8   :  { %v689_v60 = vsel %vm385_vm12, %v2850_v59, 0.0 }
 0x3c9   :  { %690 = vadd.xlane.f32.xlu1 %v689_v60 }
 0x3ca   :  { %v2264_v61 = vpop.eup %2263 }
 0x3cb   :  { %v450_v62 = vmul.f32 %v2264_v61, %v2254_v20  ;;  %v682_v63 = vpop.xlane.xlu1 %681  ;;  %v447_v0 = vpop.xlane.xlu2 %446 }
 0x3cc   :  { %v684_v4 = vsub.f32 %v676_v25, %v682_v63  ;;  %2265 = vrcp.f32 %v447_v0 }
 0x3cd   :  { %722 = vrot.lane.b32.xlu0 %v2826_v34, %s2578_s7  ;;  %v452_v5 = vpack.c.bf16 %v450_v62, %v450_v62 }
 0x3ce   :  { %v687_v6 = vmul.f32 1.442695, %v684_v4 }
 0x3cf   :  { %v607_v7 = vpop.permute.xlu0 %606  ;;  %2001 = vmatmul.msk.bf16.vlgmr.msrb.gmra.mxu2 %vm385_vm12, %v452_v5 }
 0x3d0   :  { %2267 = vpow2.f32 %v687_v6  ;;  %v612_v8 = vsel %vm457_vm13, %v607_v7, 0 }
 0x3d1   :  { %621 = vmatpush.bf16.msra.mxu3 %v612_v8 }
 0x3d2   :  { %v2266_v9 = vpop.eup %2265 }
 0x3d3   :  { %v451_v11 = vmul.f32 %v2266_v9, %v2256_v28  ;;  %v795_v12 = vpop.xlane.xlu2 %794 }
 0x3d4   :  { %v799_v13 = vsub.f32 %v791_v36, %v795_v12 }
 0x3d5   :  { %v453_v15 = vpack.c.bf16 %v451_v11, %v451_v11 }
 0x3d6   :  { %v2268_v16 = vpop.eup %2267  ;;  %v801_v19 = vmul.f32 1.442695, %v799_v13 }
 0x3d7   :  { %2002 = vmatmul.msk.bf16.vlgmr.msrb.gmra.mxu3 %vm385_vm12, %v453_v15  ;;  %v692_v20 = vsel %vm385_vm12, %v2268_v16, 0.0 }
 0x3d8   :  { %2269 = vpow2.f32 %v801_v19  ;;  %693 = vadd.xlane.f32.xlu1 %v692_v20 }
 0x3db   :  { %v583_v21 = vpop.permute.xlu2 %582 }
 0x3dc   :  { %v588_v22 = vsel %vm457_vm13, %v583_v21, 0 }
 0x3dd   :  { %597 = vmatpush.bf16.msra.mxu2 %v588_v22 }
 0x3de   :  { %v2270_v23 = vpop.eup %2269 }
 0x3df   :  { %v805_v24 = vsel %vm385_vm12, %v2270_v23, 0.0 }
 0x3e0   :  { %806 = vadd.xlane.f32.xlu2 %v805_v24 }
 0x3e3   :  { %v702_v25 = vpop.permute.xlu1 %701 }
 0x3e4   :  { %v707_v26 = vsel %vm457_vm13, %v702_v25, 0 }
 0x3e5   :  { %716 = vmatpush.bf16.msrb.mxu2 %v707_v26  ;;  %v2166_v26 = vld [vmem:[#allocation8 + $0x8] sm:$0xff] }
 0x3e6   :  { %917 = vmatpush.bf16.msrb.mxu0 %v2166_v26  ;;  %v2169_v26 = vld [vmem:[%s3119_s10] sm:$0xff] }
 0x3f1   :  { %817 = vrot.lane.b32.xlu1 %v2833_v41, %s2579_s15 }
 0x3f9   :  { %838 = vrot.lane.b32.xlu1 %v2826_v34, %s2579_s15 }
 0x3fa   :  { %v798_v28 = vpop.xlane.xlu0 %797 }
 0x3fb   :  { %v800_v30 = vsub.f32 %v2841_v43, %v798_v28  ;;  %v2165_v28 = vld [vmem:[#allocation8] sm:$0xff] }
 0x3fc   :  { %918 = vmatpush.bf16.msrb.mxu0 %v2165_v28 }
 0x3fd   :  { %v803_v31 = vmul.f32 1.442695, %v800_v30 }
 0x3ff   :  { %2271 = vpow2.f32 %v803_v31 }
 0x405   :  { %v2272_v32 = vpop.eup %2271 }
 0x406   :  { %v808_v33 = vsel %vm385_vm12, %v2272_v32, 0.0 }
 0x407   :  { %809 = vadd.xlane.f32.xlu0 %v808_v33 }
 0x42c   :  { %v569_v35 = vpop.xlane.xlu0 %568 }
 0x42d   :  { %2273 = vrcp.f32 %v569_v35 }
 0x433   :  { %v2274_v36 = vpop.eup %2273 }
 0x434   :  { %v575_v37 = vmul.f32 %v2274_v36, %v2845_v49  ;;  %v572_v2 = vpop.xlane.xlu1 %571 }
 0x435   :  { %2275 = vrcp.f32 %v572_v2 }
 0x436   :  { %v577_v18 = vpack.c.bf16 %v575_v37, %v575_v37 }
 0x438   :  { %2006 = vmatmul.msk.bf16.vlgmr.msra.gmra.mxu2 %vm385_vm12, %v577_v18 }
 0x43b   :  { %v2276_v34 = vpop.eup %2275 }
 0x43c   :  { %v576_v40 = vmul.f32 %v2276_v34, %v2260_v54  ;;  %v691_v41 = vpop.xlane.xlu1 %690 }
 0x43d   :  { %2277 = vrcp.f32 %v691_v41 }
 0x43e   :  { %v578_v42 = vpack.c.bf16 %v576_v40, %v576_v40 }
 0x43f   :  { %v723_v43 = vpop.permute.xlu0 %722 }
 0x440   :  { %v728_v10 = vsel %vm457_vm13, %v723_v43, 0  ;;  %2007 = vmatmul.msk.bf16.vlgmr.msra.gmra.mxu3 %vm385_vm12, %v578_v42 }
 0x441   :  { %737 = vmatpush.bf16.msrb.mxu3 %v728_v10 }
 0x443   :  { %v2278_v45 = vpop.eup %2277 }
 0x444   :  { %v697_v46 = vmul.f32 %v2278_v45, %v2850_v59 }
 0x446   :  { %v699_v3 = vpack.c.bf16 %v697_v46, %v697_v46 }
 0x448   :  { %2011 = vmatmul.msk.bf16.vlgmr.msrb.gmra.mxu2 %vm385_vm12, %v699_v3 }
 0x44b   :  { %v694_v47 = vpop.xlane.xlu1 %693 }
 0x44c   :  { %2279 = vrcp.f32 %v694_v47 }
 0x452   :  { %v2280_v48 = vpop.eup %2279  ;;  %v470_v49 = vpop.f32.mrf.mxu2 }
 0x453   :  { %v698_v50 = vmul.f32 %v2280_v48, %v2268_v16  ;;  %v807_v52 = vpop.xlane.xlu2 %806 }
 0x454   :  { %2281 = vrcp.f32 %v807_v52 }
 0x455   :  { %v700_v51 = vpack.c.bf16 %v698_v50, %v698_v50 }
 0x457   :  { %2012 = vmatmul.msk.bf16.vlgmr.msrb.gmra.mxu3 %vm385_vm12, %v700_v51 }
 0x45a   :  { %v472_v53 = vpop.f32.mrf.mxu2  ;;  %v489_v54 = vpop.f32.mrf.mxu3 }
 0x45b   :  { %v2282_v56 = vpop.eup %2281  ;;  %v2168_v53 = vld [vmem:[#allocation11 + $0x8] sm:$0xff] }
 0x45c   :  { %v813_v57 = vmul.f32 %v2282_v56, %v2270_v23  ;;  %993 = vmatpush.bf16.msrb.mxu1 %v2168_v53  ;;  %v2167_v56 = vld [vmem:[#allocation11] sm:$0xff] }
 0x45e   :  { %v815_v61 = vpack.c.bf16 %v813_v57, %v813_v57 }
 0x460   :  { %994 = vmatpush.bf16.msrb.mxu1 %v2167_v56 }
 0x462   :  { %v491_v58 = vpop.f32.mrf.mxu3 }
 0x463   :  { %v818_v60 = vpop.permute.xlu1 %817 }
 0x464   :  { %v823_v59 = vsel %vm457_vm13, %v818_v60, 0 }
 0x465   :  { %832 = vmatpush.bf16.msra.mxu2 %v823_v59 }
 0x468   :  { %2016 = vmatmul.msk.bf16.vlgmr.msra.gmra.mxu2 %vm385_vm12, %v815_v61 }
 0x46b   :  { %v839_v62 = vpop.permute.xlu1 %838 }
 0x46c   :  { %v844_v63 = vsel %vm457_vm13, %v839_v62, 0 }
 0x46d   :  { %853 = vmatpush.bf16.msra.mxu3 %v844_v63 }
 0x47a   :  { %v810_v0 = vpop.xlane.xlu0 %809 }
 0x47b   :  { %2283 = vrcp.f32 %v810_v0 }
 0x481   :  { %v2284_v4 = vpop.eup %2283 }
 0x482   :  { %v814_v5 = vmul.f32 %v2284_v4, %v2272_v32 }
 0x484   :  { %v816_v6 = vpack.c.bf16 %v814_v5, %v814_v5 }
 0x486   :  { %2017 = vmatmul.msk.bf16.vlgmr.msra.gmra.mxu3 %vm385_vm12, %v816_v6 }
 0x4bb   :  { %v599_v7 = vpop.f32.mrf.mxu2 }
 0x4c3   :  { %v601_v8 = vpop.f32.mrf.mxu2  ;;  %v623_v9 = vpop.f32.mrf.mxu3 }
 0x4c4   :  { %v2211_v11 = vpack.i.bf16 %v623_v9, %v599_v7 }
 0x4c6   :  { %2212 = vrot.lane.b32.xlu1 %v2211_v11, %s2570_s21 }
 0x4cb   :  { %v625_v12 = vpop.f32.mrf.mxu3  ;;  %v718_v13 = vpop.f32.mrf.mxu2 }
 0x4d3   :  { %v720_v15 = vpop.f32.mrf.mxu2 }
 0x4d4   :  { %v2242_v15 = vld [vmem:[#allocation10] ss:$0 sm:$0xff] }
 0x4da   :  { %v739_v16 = vpop.f32.mrf.mxu3 }
 0x4db   :  { %v2216_v19 = vpack.i.bf16 %v739_v16, %v718_v13 }
 0x4dd   :  { %2217 = vrot.lane.b32.xlu2 %v2216_v19, %s2562_s18 }
 0x4e2   :  { %v741_v20 = vpop.f32.mrf.mxu3 }
 0x4eb   :  { %v834_v21 = vpop.f32.mrf.mxu2 }
 0x4f3   :  { %v836_v22 = vpop.f32.mrf.mxu2 }
 0x509   :  { %v855_v23 = vpop.f32.mrf.mxu3 }
 0x50a   :  { %v2221_v24 = vpack.i.bf16 %v855_v23, %v834_v21 }
 0x50c   :  { %2222 = vrot.lane.b32.xlu1 %v2221_v24, %s2580_s2  ;;  %v2171_v24 = vld [vmem:[%s3119_s10 + $0x10] sm:$0xff] }
 0x511   :  { %v857_v25 = vpop.f32.mrf.mxu3 }
 0x512   :  { %v2170_v25 = vld [vmem:[%s3119_s10 + $0x8] sm:$0xff] }
 0x537   :  { %v2218_v33 = vpop.permute.xlu2 %2217 }
 0x538   :  { %v2213_v30 = vpop.permute.xlu1 %2212  ;;  %v2220_v37 = vunpack.i.h.bf16 %v2218_v33  ;;  %v2219_v2 = vunpack.i.l.bf16 %v2218_v33 }
 0x539   :  { %v2215_v31 = vunpack.i.h.bf16 %v2213_v30  ;;  %v2214_v32 = vunpack.i.l.bf16 %v2213_v30 }
 0x53b   :  { %v884_v35 = vsel %vm385_vm12, %v489_v54, %v2215_v31  ;;  %v883_v36 = vsel %vm385_vm12, %v470_v49, %v2214_v32 }
 0x53c   :  { %v886_v41 = vsel %vm885_vm15, %v883_v36, %v2219_v2  ;;  %v887_v42 = vsel %vm885_vm15, %v884_v35, %v2220_v37 }
 0x57e   :  { %v2223_v18 = vpop.permute.xlu1 %2222 }
 0x57f   :  { %v2225_v34 = vunpack.i.h.bf16 %v2223_v18  ;;  %v2224_v40 = vunpack.i.l.bf16 %v2223_v18 }
 0x581   :  { %v889_v43 = vsel %vm888_vm0, %v886_v41, %v2224_v40  ;;  %v890_v10 = vsel %vm888_vm0, %v887_v42, %v2225_v34  ;;  %v2174_v42 = vld [vmem:[%s3113_s4 + $0x18] sm:$0xff] }
 0x582   :  { %v891_v45 = vpack.c.bf16 %v890_v10, %v889_v43  ;;  %v2176_v43 = vld [vmem:[%s3114_s5 + $0x18] sm:$0xff]  ;;  %1124 = vmatpush.bf16.msrb.mxu3 %v2174_v42 }
 0x583   :  { %v2178_v10 = vld [vmem:[#allocation7 + $0x18] sm:$0xff]  ;;  %1157 = vmatpush.bf16.msra.mxu0 %v2176_v43 }
 0x584   :  { %2026 = vmatmul.msk.bf16.vlgmr.msrb.gmra.mxu0 %vm239_vm4, %v891_v45  ;;  %1190 = vmatpush.bf16.msra.mxu1 %v2178_v10 }
 0x601   :  { %v920_v46 = vpop.f32.mrf.mxu0 }
 0x602   :  { %v2891_v3 = vadd.f32 %v920_v46, %v2711_v14 }
 0x604   :  { %v928_v47 = vmul.f32 %v2891_v3, %v2891_v3 }
 0x606   :  { %v930_v48 = vsel %vm239_vm4, %v928_v47, 0.0  ;;  %v2175_v47 = vld [vmem:[%s3114_s5 + $0x10] sm:$0xff] }
 0x607   :  { %931 = vadd.xlane.f32.xlu0 %v930_v48  ;;  %v2177_v48 = vld [vmem:[#allocation7 + $0x10] sm:$0xff]  ;;  %1158 = vmatpush.bf16.msra.mxu0 %v2175_v47 }
 0x608   :  { %1191 = vmatpush.bf16.msra.mxu1 %v2177_v48 }
 0x609   :  { %v922_v49 = vpop.f32.mrf.mxu0 }
 0x60a   :  { %v2897_v50 = vadd.f32 %v922_v49, %v2716_v17  ;;  %v2172_v17 = vld [vmem:[%s3119_s10 + $0x18] sm:$0xff] }
 0x60b   :  { %1044 = vmatpush.bf16.msrb.mxu2 %v2172_v17 }
 0x60c   :  { %v929_v51 = vmul.f32 %v2897_v50, %v2897_v50 }
 0x60e   :  { %v933_v52 = vsel %vm239_vm4, %v929_v51, 0.0 }
 0x60f   :  { %934 = vadd.xlane.f32.xlu1 %v933_v52  ;;  %1045 = vmatpush.bf16.msrb.mxu2 %v2171_v24 }
 0x613   :  { %1046 = vmatpush.bf16.msrb.mxu2 %v2170_v25 }
 0x617   :  { %1047 = vmatpush.bf16.msrb.mxu2 %v2169_v26 }
 0x67a   :  { %v932_v14 = vpop.xlane.xlu0 %931 }
 0x67b   :  { %v936_v54 = vmul.f32 %v932_v14, %v2727_v29 }
 0x67d   :  { %v938_v57 = vadd.f32 1e-06, %v936_v54 }
 0x67f   :  { %2285 = vrsqrt.f32 %v938_v57  ;;  %vm946_vm2 = vweird.f32 %v938_v57 }
 0x682   :  { %v935_v58 = vpop.xlane.xlu1 %934 }
 0x683   :  { %v937_v60 = vmul.f32 %v935_v58, %v2727_v29 }
 0x685   :  { %v2286_v59 = vpop.eup %2285  ;;  %v939_v61 = vadd.f32 1e-06, %v937_v60 }
 0x686   :  { %v941_v62 = vmul.f32 %v2286_v59, %v938_v57  ;;  %vm947_vm1 = vweird.f32 %v2286_v59 }
 0x687   :  { %2287 = vrsqrt.f32 %v939_v61  ;;  %vm948_vm3 = vmor %vm946_vm2, %vm947_vm1  ;;  %vm956_vm6 = vweird.f32 %v939_v61 }
 0x688   :  { %v942_v63 = vmul.f32 %v2286_v59, %v941_v62 }
 0x68a   :  { %v943_v0 = vmul.f32 0.5, %v942_v63 }
 0x68c   :  { %v944_v4 = vsub.f32 1.5, %v943_v0 }
 0x68d   :  { %v2288_v5 = vpop.eup %2287 }
 0x68e   :  { %v951_v6 = vmul.f32 %v2288_v5, %v939_v61  ;;  %v945_v7 = vmul.f32 %v2286_v59, %v944_v4  ;;  %vm957_vm5 = vweird.f32 %v2288_v5  ;;  %v2243_v4 = vld [vmem:[#allocation5 + $0x1] ss:$0 sm:$0xff] }
 0x68f   :  { %vm958_vm7 = vmor %vm956_vm6, %vm957_vm5 }
 0x690   :  { %v952_v8 = vmul.f32 %v2288_v5, %v951_v6  ;;  %v949_v11 = vsel %vm948_vm3, %v2286_v59, %v945_v7 }
 0x691   :  { %v960_v16 = vmul.f32 %v949_v11, %v2891_v3 }
 0x692   :  { %v953_v9 = vmul.f32 0.5, %v952_v8 }
 0x693   :  { %v965_v21 = vmul.f32 %v2242_v15, %v960_v16 }
 0x694   :  { %v954_v12 = vsub.f32 1.5, %v953_v9 }
 0x696   :  { %v955_v13 = vmul.f32 %v2288_v5, %v954_v12 }
 0x698   :  { %v959_v19 = vsel %vm958_vm7, %v2288_v5, %v955_v13 }
 0x699   :  { %v961_v20 = vmul.f32 %v959_v19, %v2897_v50 }
 0x69b   :  { %v966_v22 = vmul.f32 %v2242_v15, %v961_v20 }
 0x69d   :  { %v967_v23 = vpack.c.bf16 %v966_v22, %v965_v21 }
 0x69f   :  { %2035 = vmatmul.msk.bf16.vlgmr.msrb.gmra.mxu1 %vm239_vm4, %v967_v23 }
 0x71c   :  { %v996_v28 = vpop.f32.mrf.mxu1 }
 0x71d   :  { %v1001_v31 = vmax.f32 %v996_v28, 0.0 }
 0x724   :  { %v998_v30 = vpop.f32.mrf.mxu1 }
 0x725   :  { %v1002_v32 = vmax.f32 %v998_v30, 0.0 }
 0x727   :  { %v1003_v33 = vpack.c.bf16 %v1002_v32, %v1001_v31 }
 0x729   :  { %2052 = vmatmul.msk.bf16.vlgmr.msrb.gmra.mxu2 %vm1036_vm8, %v1003_v33 }
 0x7ac   :  { %v1049_v35 = vpop.f32.mrf.mxu2 }
 0x7ad   :  { %v2921_v36 = vadd.f32 %v1049_v35, %v2891_v3  ;;  %v2173_v3 = vld [vmem:[%s3113_s4 + $0x10] sm:$0xff] }
 0x7ae   :  { %1125 = vmatpush.bf16.msrb.mxu3 %v2173_v3 }
 0x7af   :  { %v1058_v37 = vmul.f32 %v2921_v36, %v2921_v36 }
 0x7b1   :  { %v1060_v2 = vsel %vm239_vm4, %v1058_v37, 0.0 }
 0x7b2   :  { %1061 = vadd.xlane.f32.xlu0 %v1060_v2 }
 0x7b4   :  { %v1051_v18 = vpop.f32.mrf.mxu2 }
 0x7b5   :  { %v2927_v34 = vadd.f32 %v1051_v18, %v2897_v50 }
 0x7b7   :  { %v1059_v40 = vmul.f32 %v2927_v34, %v2927_v34 }
 0x7b9   :  { %v1063_v41 = vsel %vm239_vm4, %v1059_v40, 0.0 }
 0x7ba   :  { %1064 = vadd.xlane.f32.xlu0 %v1063_v41 }
 0x825   :  { %v1062_v45 = vpop.xlane.xlu0 %1061 }
 0x826   :  { %v1066_v46 = vmul.f32 %v1062_v45, %v2727_v29 }
 0x828   :  { %v1068_v49 = vadd.f32 1e-06, %v1066_v46 }
 0x82a   :  { %2289 = vrsqrt.f32 %v1068_v49  ;;  %vm1076_vm10 = vweird.f32 %v1068_v49 }
 0x82d   :  { %v1065_v50 = vpop.xlane.xlu0 %1064 }
 0x82e   :  { %v1067_v51 = vmul.f32 %v1065_v50, %v2727_v29 }
 0x830   :  { %v2290_v52 = vpop.eup %2289  ;;  %v1069_v53 = vadd.f32 1e-06, %v1067_v51 }
 0x831   :  { %v1071_v14 = vmul.f32 %v2290_v52, %v1068_v49  ;;  %vm1077_vm9 = vweird.f32 %v2290_v52 }
 0x832   :  { %2291 = vrsqrt.f32 %v1069_v53  ;;  %vm1078_vm11 = vmor %vm1076_vm10, %vm1077_vm9  ;;  %vm1086_vm1 = vweird.f32 %v1069_v53 }
 0x833   :  { %v1072_v54 = vmul.f32 %v2290_v52, %v1071_v14 }
 0x835   :  { %v1073_v56 = vmul.f32 0.5, %v1072_v54 }
 0x837   :  { %v1074_v57 = vsub.f32 1.5, %v1073_v56 }
 0x838   :  { %v2292_v17 = vpop.eup %2291 }
 0x839   :  { %v1081_v58 = vmul.f32 %v2292_v17, %v1069_v53  ;;  %v1075_v60 = vmul.f32 %v2290_v52, %v1074_v57  ;;  %vm1087_vm14 = vweird.f32 %v2292_v17 }
 0x83a   :  { %vm1088_vm2 = vmor %vm1086_vm1, %vm1087_vm14 }
 0x83b   :  { %v1082_v59 = vmul.f32 %v2292_v17, %v1081_v58  ;;  %v1079_v62 = vsel %vm1078_vm11, %v2290_v52, %v1075_v60 }
 0x83c   :  { %v1090_v5 = vmul.f32 %v1079_v62, %v2921_v36 }
 0x83d   :  { %v1083_v61 = vmul.f32 0.5, %v1082_v59 }
 0x83e   :  { %v1095_v8 = vmul.f32 %v2243_v4, %v1090_v5 }
 0x83f   :  { %v1084_v63 = vsub.f32 1.5, %v1083_v61 }
 0x841   :  { %v1085_v0 = vmul.f32 %v2292_v17, %v1084_v63 }
 0x843   :  { %v1089_v6 = vsel %vm1088_vm2, %v2292_v17, %v1085_v0 }
 0x844   :  { %v1091_v7 = vmul.f32 %v1089_v6, %v2927_v34 }
 0x846   :  { %v1096_v9 = vmul.f32 %v2243_v4, %v1091_v7 }
 0x848   :  { %v1097_v11 = vpack.c.bf16 %v1096_v9, %v1095_v8 }
 0x84a   :  { %2065 = vmatmul.msk.bf16.vlgmr.msrb.gmra.mxu3 %vm239_vm4, %v1097_v11  ;;  %2078 = vmatmul.msk.bf16.vlgmr.msra.gmra.mxu0 %vm239_vm4, %v1097_v11 }
 0x84b   :  { %2087 = vmatmul.msk.bf16.vlgmr.msra.gmra.mxu1 %vm239_vm4, %v1097_v11 }
 0x8c7   :  { %v1160_v12 = vpop.f32.mrf.mxu0 }
 0x8c8   :  { %v1165_v13 = vpack.c.bf16 %v1160_v12, %v1160_v12  ;;  %v1193_v15 = vpop.f32.mrf.mxu1 }
 0x8c9   :  { %v2951_v16 = vpack.c.bf16 %v1193_v15, %v1193_v15 }
 0x8ca   :  { %v1205_v19 = vsel %vm385_vm12, %v1165_v13, 0  ;;  %v1310_v20 = vunpack.c.l.b16 %v1165_v13 }
 0x8cb   :  { %v1269_v21 = vsel %vm457_vm13, %v2951_v16, 0  ;;  %1214 = vmatpush.bf16.xpose.msra.mxu2 %v1205_v19 }
 0x8cc   :  { %v1311_v22 = vpack.c.b16 %v1310_v20, %v1310_v20  ;;  %1278 = vmatpush.bf16.msrb.mxu0 %v1269_v21 }
 0x8cd   :  { %v1127_v23 = vpop.f32.mrf.mxu3 }
 0x8ce   :  { %v1132_v24 = vpack.c.bf16 %v1127_v23, %v1127_v23  ;;  %1312 = vrot.lane.b32.xlu2 %v1311_v22, %s2577_s30 }
 0x8cf   :  { %v1162_v25 = vpop.f32.mrf.mxu0 }
 0x8d0   :  { %v1305_v26 = vunpack.c.l.b16 %v1132_v24  ;;  %v1166_v28 = vpack.c.bf16 %v1162_v25, %v1162_v25  ;;  %v1195_v30 = vpop.f32.mrf.mxu1 }
 0x8d1   :  { %v2957_v31 = vpack.c.bf16 %v1195_v30, %v1195_v30 }
 0x8d2   :  { %v1306_v32 = vpack.c.b16 %v1305_v26, %v1305_v26  ;;  %v1224_v33 = vsel %vm385_vm12, %v1166_v28, 0  ;;  %v1339_v35 = vunpack.c.l.b16 %v1166_v28  ;;  %2088 = vmatmul.msk.bf16.vlgmr.msra.gmra.mxu2 %vm385_vm12, %v1132_v24 }
 0x8d3   :  { %v1288_v37 = vsel %vm457_vm13, %v2957_v31, 0  ;;  %1233 = vmatpush.bf16.xpose.msra.mxu3 %v1224_v33 }
 0x8d4   :  { %v1340_v2 = vpack.c.b16 %v1339_v35, %v1339_v35  ;;  %1297 = vmatpush.bf16.msrb.mxu1 %v1288_v37  ;;  %1437 = vrot.lane.b32.xlu1 %v1306_v32, %s2578_s7 }
 0x8d5   :  { %v1129_v18 = vpop.f32.mrf.mxu3 }
 0x8d6   :  { %v1133_v40 = vpack.c.bf16 %v1129_v18, %v1129_v18  ;;  %1341 = vrot.lane.b32.xlu0 %v1340_v2, %s2577_s30  ;;  %1307 = vrot.lane.b32.xlu2 %v1306_v32, %s2577_s30 }
 0x8d8   :  { %v1334_v41 = vunpack.c.l.b16 %v1133_v40 }
 0x8da   :  { %2089 = vmatmul.msk.bf16.vlgmr.msra.gmra.mxu3 %vm385_vm12, %v1133_v40  ;;  %v1335_v42 = vpack.c.b16 %v1334_v41, %v1334_v41  ;;  %v1389_v41 = vunpack.c.l.b16 %v2951_v16  ;;  %v1413_v16 = vunpack.c.l.b16 %v2957_v31 }
 0x8de   :  { %1462 = vrot.lane.b32.xlu0 %v1340_v2, %s2578_s7  ;;  %1336 = vrot.lane.b32.xlu2 %v1335_v42, %s2577_s30 }
 0x8e6   :  { %1554 = vrot.lane.b32.xlu0 %v1311_v22, %s2579_s15  ;;  %1439 = vrot.lane.b32.xlu2 %v1311_v22, %s2578_s7 }
 0x8ee   :  { %1552 = vrot.lane.b32.xlu0 %v1306_v32, %s2579_s15  ;;  %1460 = vrot.lane.b32.xlu2 %v1335_v42, %s2578_s7 }
 0x8f6   :  { %1577 = vrot.lane.b32.xlu2 %v1340_v2, %s2579_s15 }
 0x8fe   :  { %1575 = vrot.lane.b32.xlu2 %v1335_v42, %s2579_s15  ;;  %v3010_v42 = vpack.c.b16 %v1389_v41, %v1389_v41 }
 0x928   :  { %v1313_v43 = vpop.permute.xlu2 %1312 }
 0x929   :  { %v1318_v10 = vsel %vm385_vm12, %v1313_v43, 0 }
 0x92a   :  { %1327 = vmatpush.bf16.xpose.msrb.mxu2 %v1318_v10 }
 0x930   :  { %v1308_v45 = vpop.permute.xlu2 %1307 }
 0x931   :  { %2093 = vmatmul.msk.bf16.vlgmr.msrb.gmra.mxu2 %vm385_vm12, %v1308_v45 }
 0x938   :  { %v1337_v46 = vpop.permute.xlu2 %1336 }
 0x940   :  { %v1440_v3 = vpop.permute.xlu2 %1439 }
 0x941   :  { %v1445_v47 = vsel %vm385_vm12, %v1440_v3, 0 }
 0x942   :  { %1454 = vmatpush.bf16.xpose.msra.mxu2 %v1445_v47 }
 0x946   :  { %v1438_v48 = vpop.permute.xlu1 %1437 }
 0x948   :  { %v1342_v49 = vpop.permute.xlu0 %1341  ;;  %v1461_v50 = vpop.permute.xlu2 %1460 }
 0x949   :  { %v1347_v51 = vsel %vm385_vm12, %v1342_v49, 0  ;;  %2098 = vmatmul.msk.bf16.vlgmr.msra.gmra.mxu2 %vm385_vm12, %v1438_v48  ;;  %v1414_v48 = vpack.c.b16 %v1413_v16, %v1413_v16 }
 0x94a   :  { %1356 = vmatpush.bf16.xpose.msrb.mxu3 %v1347_v51 }
 0x950   :  { %v1463_v52 = vpop.permute.xlu0 %1462  ;;  %v1578_v53 = vpop.permute.xlu2 %1577 }
 0x951   :  { %v1468_v14 = vsel %vm385_vm12, %v1463_v52, 0  ;;  %v1583_v54 = vsel %vm385_vm12, %v1578_v53, 0  ;;  %2094 = vmatmul.msk.bf16.vlgmr.msrb.gmra.mxu3 %vm385_vm12, %v1337_v46 }
 0x952   :  { %1477 = vmatpush.bf16.xpose.msra.mxu3 %v1468_v14 }
 0x955   :  { %v1216_v56 = vpop.f32.mrf.mxu2 }
 0x956   :  { %v1217_v57 = vadd.f32 %v1216_v56, %v2779_v38 }
 0x958   :  { %v1555_v17 = vpop.permute.xlu0 %1554  ;;  %v1239_v58 = vadd.f32 %v1217_v57, %v2781_v39  ;;  %v1576_v7 = vpop.permute.xlu2 %1575 }
 0x959   :  { %v1560_v60 = vsel %vm385_vm12, %v1555_v17, 0 }
 0x95a   :  { %1592 = vmatpush.bf16.xpose.msrb.mxu3 %v1583_v54  ;;  %1569 = vmatpush.bf16.xpose.msrb.mxu2 %v1560_v60  ;;  %v1241_v59 = vsel %vm385_vm12, %v1239_v58, -inf }
 0x95b   :  { %1242 = vmax.xlane.f32.xlu0 %v1241_v59 }
 0x95d   :  { %v1218_v61 = vpop.f32.mrf.mxu2  ;;  %v1235_v62 = vpop.f32.mrf.mxu3 }
 0x95e   :  { %v1236_v63 = vadd.f32 %v1235_v62, %v2779_v38 }
 0x960   :  { %v1553_v0 = vpop.permute.xlu0 %1552  ;;  %v1240_v4 = vadd.f32 %v1236_v63, %v2787_v44 }
 0x961   :  { %2099 = vmatmul.msk.bf16.vlgmr.msra.gmra.mxu3 %vm385_vm12, %v1461_v50  ;;  %2103 = vmatmul.msk.bf16.vlgmr.msrb.gmra.mxu2 %vm385_vm12, %v1553_v0 }
 0x962   :  { %v1244_v5 = vsel %vm385_vm12, %v1240_v4, -inf }
 0x963   :  { %1245 = vmax.xlane.f32.xlu1 %v1244_v5 }
 0x965   :  { %v1237_v6 = vpop.f32.mrf.mxu3 }
 0x971   :  { %2104 = vmatmul.msk.bf16.vlgmr.msrb.gmra.mxu3 %vm385_vm12, %v1576_v7 }
 0x9b4   :  { %v1329_v8 = vpop.f32.mrf.mxu2 }
 0x9b5   :  { %v1330_v9 = vadd.f32 %v2798_v55, %v1329_v8 }
 0x9b7   :  { %v1362_v11 = vadd.f32 %v1330_v9, %v2781_v39 }
 0x9b9   :  { %v1364_v38 = vsel %vm385_vm12, %v1362_v11, -inf }
 0x9ba   :  { %1365 = vmax.xlane.f32.xlu2 %v1364_v38 }
 0x9bc   :  { %v1331_v12 = vpop.f32.mrf.mxu2 }
 0x9cc   :  { %v1456_v13 = vpop.f32.mrf.mxu2 }
 0x9cd   :  { %v1457_v15 = vadd.f32 %v2809_v1, %v1456_v13 }
 0x9ce   :  { %v1243_v19 = vpop.xlane.xlu0 %1242 }
 0x9cf   :  { %v1247_v20 = vsub.f32 %v1239_v58, %v1243_v19  ;;  %v2998_v21 = vadd.f32 %v1457_v15, %v2781_v39 }
 0x9d1   :  { %v1249_v22 = vmul.f32 1.442695, %v1247_v20  ;;  %v1485_v23 = vsel %vm385_vm12, %v2998_v21, -inf }
 0x9d2   :  { %1486 = vmax.xlane.f32.xlu1 %v1485_v23 }
 0x9d3   :  { %2293 = vpow2.f32 %v1249_v22 }
 0x9d4   :  { %v1358_v24 = vpop.f32.mrf.mxu3  ;;  %v1458_v25 = vpop.f32.mrf.mxu2 }
 0x9d5   :  { %v1359_v26 = vadd.f32 %v2798_v55, %v1358_v24 }
 0x9d6   :  { %v1246_v49 = vpop.xlane.xlu1 %1245 }
 0x9d7   :  { %v1363_v28 = vadd.f32 %v1359_v26, %v2787_v44  ;;  %v1248_v50 = vsub.f32 %v1240_v4, %v1246_v49 }
 0x9d9   :  { %v2294_v30 = vpop.eup %2293  ;;  %v1367_v32 = vsel %vm385_vm12, %v1363_v28, -inf  ;;  %v1251_v51 = vmul.f32 1.442695, %v1248_v50 }
 0x9da   :  { %1368 = vmax.xlane.f32.xlu0 %v1367_v32  ;;  %v1253_v33 = vsel %vm385_vm12, %v2294_v30, 0.0 }
 0x9db   :  { %1254 = vadd.xlane.f32.xlu2 %v1253_v33  ;;  %2295 = vpow2.f32 %v1251_v51 }
 0x9dc   :  { %v1360_v35 = vpop.f32.mrf.mxu3 }
 0x9e1   :  { %v2296_v52 = vpop.eup %2295 }
 0x9e2   :  { %v1256_v14 = vsel %vm385_vm12, %v2296_v52, 0.0 }
 0x9e4   :  { %v1479_v37 = vpop.f32.mrf.mxu3  ;;  %v1571_v2 = vpop.f32.mrf.mxu2 }
 0x9e5   :  { %v1480_v18 = vadd.f32 %v2809_v1, %v1479_v37  ;;  %v1572_v53 = vadd.f32 %v2820_v27, %v1571_v2 }
 0x9e7   :  { %v1484_v40 = vadd.f32 %v1480_v18, %v2787_v44 }
 0x9e9   :  { %v1488_v55 = vsel %vm385_vm12, %v1484_v40, -inf }
 0x9ea   :  { %1489 = vmax.xlane.f32.xlu2 %v1488_v55 }
 0x9ec   :  { %v1481_v43 = vpop.f32.mrf.mxu3  ;;  %v1573_v10 = vpop.f32.mrf.mxu2 }
 0x9ee   :  { %1391 = vrot.lane.b32.xlu0 %v3010_v42, %s2577_s30 }
 0x9f4   :  { %v1594_v45 = vpop.f32.mrf.mxu3 }
 0x9f5   :  { %v1595_v46 = vadd.f32 %v2820_v27, %v1594_v45 }
 0x9f7   :  { %v1599_v3 = vadd.f32 %v1595_v46, %v2787_v44  ;;  %v1598_v44 = vadd.f32 %v1572_v53, %v2781_v39 }
 0x9f9   :  { %v1603_v1 = vsel %vm385_vm12, %v1599_v3, -inf  ;;  %v1600_v54 = vsel %vm385_vm12, %v1598_v44, -inf }
 0x9fa   :  { %1604 = vmax.xlane.f32.xlu1 %v1603_v1 }
 0x9fc   :  { %v1596_v47 = vpop.f32.mrf.mxu3 }
 0xa02   :  { %1530 = vrot.lane.b32.xlu2 %v1414_v48, %s2578_s7 }
 0xa18   :  { %1257 = vadd.xlane.f32.xlu0 %v1256_v14 }
 0xa20   :  { %1601 = vmax.xlane.f32.xlu0 %v1600_v54 }
 0xa2d   :  { %v1366_v31 = vpop.xlane.xlu2 %1365 }
 0xa2e   :  { %v1370_v56 = vsub.f32 %v1362_v11, %v1366_v31 }
 0xa30   :  { %v1372_v57 = vmul.f32 1.442695, %v1370_v56 }
 0xa32   :  { %2297 = vpow2.f32 %v1372_v57 }
 0xa34   :  { %1509 = vrot.lane.b32.xlu0 %v3010_v42, %s2578_s7 }
 0xa38   :  { %v2298_v17 = vpop.eup %2297 }
 0xa39   :  { %v1376_v58 = vsel %vm385_vm12, %v2298_v17, 0.0 }
 0xa3a   :  { %1377 = vadd.xlane.f32.xlu1 %v1376_v58 }
 0xa45   :  { %v1487_v27 = vpop.xlane.xlu1 %1486 }
 0xa46   :  { %v1491_v39 = vsub.f32 %v2998_v21, %v1487_v27 }
 0xa48   :  { %v1493_v63 = vmul.f32 1.442695, %v1491_v39 }
 0xa4d   :  { %v1369_v60 = vpop.xlane.xlu0 %1368 }
 0xa4e   :  { %v1371_v59 = vsub.f32 %v1363_v28, %v1369_v60  ;;  %v1255_v61 = vpop.xlane.xlu2 %1254 }
 0xa4f   :  { %2299 = vrcp.f32 %v1255_v61 }
 0xa50   :  { %v1374_v62 = vmul.f32 1.442695, %v1371_v59 }
 0xa52   :  { %2301 = vpow2.f32 %v1374_v62 }
 0xa53   :  { %1415 = vrot.lane.b32.xlu1 %v1414_v48, %s2577_s30  ;;  %2303 = vpow2.f32 %v1493_v63 }
 0xa55   :  { %v2300_v0 = vpop.eup %2299 }
 0xa56   :  { %v1261_v4 = vmul.f32 %v2300_v0, %v2294_v30 }
 0xa58   :  { %v2302_v5 = vpop.eup %2301  ;;  %v1263_v6 = vpack.c.bf16 %v1261_v4, %v1261_v4 }
 0xa59   :  { %v1379_v7 = vsel %vm385_vm12, %v2302_v5, 0.0  ;;  %v2304_v9 = vpop.eup %2303 }
 0xa5a   :  { %2090 = vmatmul.msk.bf16.vlgmr.msrb.gmra.mxu0 %vm385_vm12, %v1263_v6  ;;  %1380 = vadd.xlane.f32.xlu2 %v1379_v7  ;;  %v1497_v15 = vsel %vm385_vm12, %v2304_v9, 0.0 }
 0xa5d   :  { %v1490_v8 = vpop.xlane.xlu2 %1489 }
 0xa5e   :  { %v1492_v11 = vsub.f32 %v1484_v40, %v1490_v8 }
 0xa60   :  { %v1495_v38 = vmul.f32 1.442695, %v1492_v11  ;;  %v1392_v12 = vpop.permute.xlu0 %1391 }
 0xa61   :  { %v1397_v13 = vsel %vm457_vm13, %v1392_v12, 0 }
 0xa62   :  { %2305 = vpow2.f32 %v1495_v38  ;;  %1406 = vmatpush.bf16.msra.mxu0 %v1397_v13  ;;  %1498 = vadd.xlane.f32.xlu2 %v1497_v15 }
 0xa65   :  { %v1531_v45 = vpop.permute.xlu2 %1530 }
 0xa66   :  { %v1536_v1 = vsel %vm457_vm13, %v1531_v45, 0 }
 0xa68   :  { %v2306_v19 = vpop.eup %2305 }
 0xa69   :  { %v1500_v20 = vsel %vm385_vm12, %v2306_v19, 0.0 }
 0xa6a   :  { %1501 = vadd.xlane.f32.xlu2 %v1500_v20 }
 0xa6d   :  { %v1605_v21 = vpop.xlane.xlu1 %1604 }
 0xa6e   :  { %v1607_v22 = vsub.f32 %v1599_v3, %v1605_v21 }
 0xa70   :  { %v1610_v23 = vmul.f32 1.442695, %v1607_v22 }
 0xa72   :  { %2307 = vpow2.f32 %v1610_v23 }
 0xa78   :  { %v2308_v24 = vpop.eup %2307 }
 0xa79   :  { %v1615_v25 = vsel %vm385_vm12, %v2308_v24, 0.0 }
 0xa7d   :  { %1616 = vadd.xlane.f32.xlu1 %v1615_v25 }
 0xa82   :  { %1624 = vrot.lane.b32.xlu2 %v3010_v42, %s2579_s15 }
 0xa8a   :  { %1645 = vrot.lane.b32.xlu2 %v1414_v48, %s2579_s15 }
 0xa8b   :  { %v1258_v26 = vpop.xlane.xlu0 %1257 }
 0xa8c   :  { %2309 = vrcp.f32 %v1258_v26 }
 0xa92   :  { %v2310_v28 = vpop.eup %2309 }
 0xa93   :  { %v1262_v30 = vmul.f32 %v2310_v28, %v2296_v52  ;;  %v1602_v32 = vpop.xlane.xlu0 %1601  ;;  %v2180_v28 = vld [vmem:[#allocation8 + $0x18] sm:$0xff] }
 0xa94   :  { %v1606_v33 = vsub.f32 %v1598_v44, %v1602_v32  ;;  %1723 = vmatpush.bf16.msra.mxu2 %v2180_v28 }
 0xa95   :  { %v1264_v35 = vpack.c.bf16 %v1262_v30, %v1262_v30  ;;  %v2179_v30 = vld [vmem:[#allocation8 + $0x10] sm:$0xff] }
 0xa96   :  { %v1608_v37 = vmul.f32 1.442695, %v1606_v33 }
 0xa97   :  { %2091 = vmatmul.msk.bf16.vlgmr.msrb.gmra.mxu1 %vm385_vm12, %v1264_v35 }
 0xa98   :  { %2311 = vpow2.f32 %v1608_v37  ;;  %1724 = vmatpush.bf16.msra.mxu2 %v2179_v30 }
 0xa9e   :  { %v2312_v2 = vpop.eup %2311 }
 0xa9f   :  { %v1612_v18 = vsel %vm385_vm12, %v2312_v2, 0.0 }
 0xaa0   :  { %1613 = vadd.xlane.f32.xlu0 %v1612_v18 }
 0xaa6   :  { %v1510_v40 = vpop.permute.xlu0 %1509 }
 0xaa7   :  { %v1515_v41 = vsel %vm457_vm13, %v1510_v40, 0 }
 0xaa8   :  { %1524 = vmatpush.bf16.msrb.mxu0 %v1515_v41 }
 0xaad   :  { %v1378_v55 = vpop.xlane.xlu1 %1377 }
 0xaae   :  { %2313 = vrcp.f32 %v1378_v55 }
 0xab4   :  { %v2314_v42 = vpop.eup %2313 }
 0xab5   :  { %v1384_v43 = vmul.f32 %v2314_v42, %v2298_v17 }
 0xab7   :  { %v1386_v10 = vpack.c.bf16 %v1384_v43, %v1384_v43 }
 0xab9   :  { %2095 = vmatmul.msk.bf16.vlgmr.msra.gmra.mxu0 %vm385_vm12, %v1386_v10 }
 0xac5   :  { %v1416_v46 = vpop.permute.xlu1 %1415 }
 0xac6   :  { %v1421_v3 = vsel %vm457_vm13, %v1416_v46, 0 }
 0xac7   :  { %1430 = vmatpush.bf16.msra.mxu1 %v1421_v3 }
 0xacb   :  { %1545 = vmatpush.bf16.msrb.mxu1 %v1536_v1 }
 0xacd   :  { %v1381_v16 = vpop.xlane.xlu2 %1380 }
 0xace   :  { %2315 = vrcp.f32 %v1381_v16 }
 0xad4   :  { %v2316_v47 = vpop.eup %2315 }
 0xad5   :  { %v1385_v48 = vmul.f32 %v2316_v47, %v2302_v5  ;;  %v1499_v49 = vpop.xlane.xlu2 %1498 }
 0xad6   :  { %2317 = vrcp.f32 %v1499_v49 }
 0xad7   :  { %v1387_v50 = vpack.c.bf16 %v1385_v48, %v1385_v48  ;;  %v3043_v51 = vpop.f32.mrf.mxu0 }
 0xad9   :  { %2096 = vmatmul.msk.bf16.vlgmr.msra.gmra.mxu1 %vm385_vm12, %v1387_v50 }
 0xadc   :  { %v2318_v52 = vpop.eup %2317 }
 0xadd   :  { %v1505_v53 = vmul.f32 %v2318_v52, %v2304_v9  ;;  %v1502_v14 = vpop.xlane.xlu2 %1501 }
 0xade   :  { %2319 = vrcp.f32 %v1502_v14  ;;  %v2182_v14 = vld [vmem:[#allocation11 + $0x18] sm:$0xff] }
 0xadf   :  { %v1507_v44 = vpack.c.bf16 %v1505_v53, %v1505_v53  ;;  %v1282_v54 = vpop.f32.mrf.mxu0  ;;  %1801 = vmatpush.bf16.msra.mxu3 %v2182_v14 }
 0xae0   :  { %v2181_v54 = vld [vmem:[#allocation11 + $0x10] sm:$0xff] }
 0xae1   :  { %2100 = vmatmul.msk.bf16.vlgmr.msrb.gmra.mxu0 %vm385_vm12, %v1507_v44 }
 0xae3   :  { %1802 = vmatpush.bf16.msra.mxu3 %v2181_v54 }
 0xae4   :  { %v2320_v31 = vpop.eup %2319 }
 0xae5   :  { %v1506_v56 = vmul.f32 %v2320_v31, %v2306_v19  ;;  %v1625_v57 = vpop.permute.xlu2 %1624 }
 0xae6   :  { %v1630_v17 = vsel %vm457_vm13, %v1625_v57, 0 }
 0xae7   :  { %v1508_v58 = vpack.c.bf16 %v1506_v56, %v1506_v56  ;;  %1639 = vmatpush.bf16.msra.mxu0 %v1630_v17 }
 0xae9   :  { %2101 = vmatmul.msk.bf16.vlgmr.msrb.gmra.mxu1 %vm385_vm12, %v1508_v58 }
 0xaed   :  { %v1646_v27 = vpop.permute.xlu2 %1645 }
 0xaee   :  { %v1651_v60 = vsel %vm457_vm13, %v1646_v27, 0 }
 0xaef   :  { %1660 = vmatpush.bf16.msra.mxu1 %v1651_v60 }
 0xaf0   :  { %v1617_v59 = vpop.xlane.xlu1 %1616 }
 0xaf1   :  { %2321 = vrcp.f32 %v1617_v59 }
 0xaf7   :  { %v2322_v61 = vpop.eup %2321 }
 0xaf8   :  { %v1621_v39 = vmul.f32 %v2322_v61, %v2308_v24 }
 0xafa   :  { %v1623_v62 = vpack.c.bf16 %v1621_v39, %v1621_v39 }
 0xafc   :  { %2106 = vmatmul.msk.bf16.vlgmr.msra.gmra.mxu1 %vm385_vm12, %v1623_v62 }
 0xb13   :  { %v1614_v63 = vpop.xlane.xlu0 %1613 }
 0xb14   :  { %2323 = vrcp.f32 %v1614_v63  ;;  %v1299_v0 = vpop.f32.mrf.mxu1 }
 0xb1a   :  { %v2324_v4 = vpop.eup %2323 }
 0xb1b   :  { %v1620_v5 = vmul.f32 %v2324_v4, %v2312_v2 }
 0xb1c   :  { %v1301_v6 = vpop.f32.mrf.mxu1 }
 0xb1d   :  { %v1622_v7 = vpack.c.bf16 %v1620_v5, %v1620_v5 }
 0xb1f   :  { %2105 = vmatmul.msk.bf16.vlgmr.msra.gmra.mxu0 %vm385_vm12, %v1622_v7 }
 0xb36   :  { %v1408_v8 = vpop.f32.mrf.mxu0 }
 0xb3e   :  { %v1410_v9 = vpop.f32.mrf.mxu0 }
 0xb56   :  { %v1432_v11 = vpop.f32.mrf.mxu1 }
 0xb57   :  { %v2226_v38 = vpack.i.bf16 %v1432_v11, %v1408_v8  ;;  %v2244_v8 = vld [vmem:[#allocation10 + $0x1] ss:$0 sm:$0xff] }
 0xb59   :  { %2227 = vrot.lane.b32.xlu2 %v2226_v38, %s2570_s21 }
 0xb5e   :  { %v1434_v12 = vpop.f32.mrf.mxu1  ;;  %v1526_v13 = vpop.f32.mrf.mxu0 }
 0xb66   :  { %v1528_v15 = vpop.f32.mrf.mxu0  ;;  %v1547_v19 = vpop.f32.mrf.mxu1 }
 0xb67   :  { %v2231_v20 = vpack.i.bf16 %v1547_v19, %v1526_v13  ;;  %v2185_v19 = vld [vmem:[%s3119_s10 + $0x30] sm:$0xff] }
 0xb69   :  { %2232 = vrot.lane.b32.xlu2 %v2231_v20, %s2562_s18  ;;  %v2184_v20 = vld [vmem:[%s3119_s10 + $0x28] sm:$0xff] }
 0xb6e   :  { %v1549_v21 = vpop.f32.mrf.mxu1 }
 0xb6f   :  { %v2183_v21 = vld [vmem:[%s3119_s10 + $0x20] sm:$0xff] }
 0xb79   :  { %v1662_v22 = vpop.f32.mrf.mxu1 }
 0xb81   :  { %v1664_v23 = vpop.f32.mrf.mxu1 }
 0xb9c   :  { %v1641_v24 = vpop.f32.mrf.mxu0 }
 0xb9d   :  { %v2236_v25 = vpack.i.bf16 %v1662_v22, %v1641_v24 }
 0xb9f   :  { %2237 = vrot.lane.b32.xlu0 %v2236_v25, %s2580_s2  ;;  %s2581_s2 = smov [#allocation16]  }
 0xba0   :  { %s1948_s12 = sshll.u32 %s2581_s2, 4  ;;  %s1949_s12 = int_to_ptr.vmem [resolvable:$true] %s1948_s12 }
 0xba4   :  { %v1643_v26 = vpop.f32.mrf.mxu0 }
 0xbb3   :  { %v2228_v32 = vpop.permute.xlu2 %2227 }
 0xbb4   :  { %v2230_v35 = vunpack.i.h.bf16 %v2228_v32  ;;  %v2229_v37 = vunpack.i.l.bf16 %v2228_v32 }
 0xbb6   :  { %v1691_v41 = vsel %vm385_vm12, %v1299_v0, %v2230_v35  ;;  %v1690_v55 = vsel %vm385_vm12, %v3043_v51, %v2229_v37 }
 0xbc3   :  { %v2233_v33 = vpop.permute.xlu2 %2232 }
 0xbc4   :  { %v2235_v2 = vunpack.i.h.bf16 %v2233_v33  ;;  %v2234_v18 = vunpack.i.l.bf16 %v2233_v33 }
 0xbc6   :  { %v1693_v10 = vsel %vm885_vm15, %v1691_v41, %v2235_v2  ;;  %v1692_v45 = vsel %vm885_vm15, %v1690_v55, %v2234_v18 }
 0xc11   :  { %v2238_v40 = vpop.permute.xlu0 %2237 }
 0xc12   :  { %v2240_v42 = vunpack.i.h.bf16 %v2238_v40  ;;  %v2239_v43 = vunpack.i.l.bf16 %v2238_v40  ;;  %v2188_v40 = vld [vmem:[#allocation13 + $0x8] sm:$0xff] }
 0xc13   :  { %1934 = vmatpush.bf16.msrb.mxu1 %v2188_v40 }
 0xc14   :  { %v1695_v46 = vsel %vm888_vm0, %v1693_v10, %v2240_v42  ;;  %v1694_v3 = vsel %vm888_vm0, %v1692_v45, %v2239_v43  ;;  %v2187_v42 = vld [vmem:[#allocation13] sm:$0xff] }
 0xc15   :  { %v1696_v1 = vpack.c.bf16 %v1695_v46, %v1694_v3 }
 0xc17   :  { %2115 = vmatmul.msk.bf16.vlgmr.msra.gmra.mxu2 %vm239_vm4, %v1696_v1  ;;  %1935 = vmatpush.bf16.msrb.mxu1 %v2187_v42 }
 0xc9a   :  { %v1726_v16 = vpop.f32.mrf.mxu2 }
 0xc9b   :  { %v3064_v47 = vadd.f32 %v1726_v16, %v2921_v36 }
 0xc9d   :  { %v1735_v48 = vmul.f32 %v3064_v47, %v3064_v47 }
 0xc9f   :  { %v1737_v49 = vsel %vm239_vm4, %v1735_v48, 0.0 }
 0xca0   :  { %1738 = vadd.xlane.f32.xlu1 %v1737_v49 }
 0xca2   :  { %v1728_v50 = vpop.f32.mrf.mxu2 }
 0xca3   :  { %v3070_v51 = vadd.f32 %v1728_v50, %v2927_v34  ;;  %v2186_v34 = vld [vmem:[%s3119_s10 + $0x38] sm:$0xff] }
 0xca4   :  { %1852 = vmatpush.bf16.msrb.mxu0 %v2186_v34 }
 0xca5   :  { %v1736_v52 = vmul.f32 %v3070_v51, %v3070_v51 }
 0xca7   :  { %v1740_v53 = vsel %vm239_vm4, %v1736_v52, 0.0 }
 0xca8   :  { %1741 = vadd.xlane.f32.xlu2 %v1740_v53  ;;  %1853 = vmatpush.bf16.msrb.mxu0 %v2185_v19 }
 0xcac   :  { %1854 = vmatpush.bf16.msrb.mxu0 %v2184_v20 }
 0xcb0   :  { %1855 = vmatpush.bf16.msrb.mxu0 %v2183_v21 }
 0xd13   :  { %v1739_v36 = vpop.xlane.xlu1 %1738 }
 0xd14   :  { %v1743_v44 = vmul.f32 %v1739_v36, %v2727_v29 }
 0xd16   :  { %v1745_v31 = vadd.f32 1e-06, %v1743_v44 }
 0xd18   :  { %2325 = vrsqrt.f32 %v1745_v31  ;;  %vm1753_vm13 = vweird.f32 %v1745_v31 }
 0xd1b   :  { %v1742_v56 = vpop.xlane.xlu2 %1741 }
 0xd1c   :  { %v1744_v57 = vmul.f32 %v1742_v56, %v2727_v29 }
 0xd1e   :  { %v2326_v17 = vpop.eup %2325  ;;  %v1746_v58 = vadd.f32 1e-06, %v1744_v57 }
 0xd1f   :  { %v1748_v27 = vmul.f32 %v2326_v17, %v1745_v31  ;;  %vm1754_vm12 = vweird.f32 %v2326_v17 }
 0xd20   :  { %2327 = vrsqrt.f32 %v1746_v58  ;;  %vm1755_vm15 = vmor %vm1753_vm13, %vm1754_vm12  ;;  %vm1763_vm3 = vweird.f32 %v1746_v58 }
 0xd21   :  { %v1749_v60 = vmul.f32 %v2326_v17, %v1748_v27 }
 0xd23   :  { %v1750_v59 = vmul.f32 0.5, %v1749_v60 }
 0xd25   :  { %v1751_v61 = vsub.f32 1.5, %v1750_v59 }
 0xd26   :  { %v2328_v39 = vpop.eup %2327 }
 0xd27   :  { %v1758_v62 = vmul.f32 %v2328_v39, %v1746_v58  ;;  %v1752_v63 = vmul.f32 %v2326_v17, %v1751_v61  ;;  %vm1764_vm0 = vweird.f32 %v2328_v39  ;;  %v2246_v58 = vld [vmem:[#allocation14] ss:$0 sm:$0xff] }
 0xd28   :  { %vm1765_vm5 = vmor %vm1763_vm3, %vm1764_vm0 }
 0xd29   :  { %v1759_v0 = vmul.f32 %v2328_v39, %v1758_v62  ;;  %v1756_v5 = vsel %vm1755_vm15, %v2326_v17, %v1752_v63 }
 0xd2a   :  { %v1767_v9 = vmul.f32 %v1756_v5, %v3064_v47 }
 0xd2b   :  { %v1760_v4 = vmul.f32 0.5, %v1759_v0 }
 0xd2c   :  { %v1772_v12 = vmul.f32 %v2244_v8, %v1767_v9 }
 0xd2d   :  { %v1761_v6 = vsub.f32 1.5, %v1760_v4 }
 0xd2f   :  { %v1762_v7 = vmul.f32 %v2328_v39, %v1761_v6 }
 0xd31   :  { %v1766_v11 = vsel %vm1765_vm5, %v2328_v39, %v1762_v7 }
 0xd32   :  { %v1768_v38 = vmul.f32 %v1766_v11, %v3070_v51 }
 0xd34   :  { %v1773_v13 = vmul.f32 %v2244_v8, %v1768_v38 }
 0xd36   :  { %v1774_v15 = vpack.c.bf16 %v1773_v13, %v1772_v12 }
 0xd38   :  { %2124 = vmatmul.msk.bf16.vlgmr.msra.gmra.mxu3 %vm239_vm4, %v1774_v15 }
 0xdbb   :  { %v1804_v22 = vpop.f32.mrf.mxu3 }
 0xdbc   :  { %v1809_v24 = vmax.f32 %v1804_v22, 0.0 }
 0xdc3   :  { %v1806_v23 = vpop.f32.mrf.mxu3 }
 0xdc4   :  { %v1810_v25 = vmax.f32 %v1806_v23, 0.0 }
 0xdc6   :  { %v1811_v26 = vpack.c.bf16 %v1810_v25, %v1809_v24 }
 0xdc8   :  { %2149 = vmatmul.msk.bf16.vlgmr.msrb.gmra.mxu0 %vm1036_vm8, %v1811_v26 }
 0xe45   :  { %v1857_v28 = vpop.f32.mrf.mxu0 }
 0xe46   :  { %v1862_v30 = vadd.f32 %v1857_v28, %v3064_v47 }
 0xe48   :  { %v1865_v32 = vmul.f32 %v1862_v30, %v1862_v30 }
 0xe4a   :  { %v1867_v33 = vsel %vm239_vm4, %v1865_v32, 0.0 }
 0xe4b   :  { %1868 = vadd.xlane.f32.xlu1 %v1867_v33 }
 0xe4d   :  { %v1859_v35 = vpop.f32.mrf.mxu0 }
 0xe4e   :  { %v1863_v37 = vadd.f32 %v1859_v35, %v3070_v51 }
 0xe50   :  { %v1866_v2 = vmul.f32 %v1863_v37, %v1863_v37 }
 0xe52   :  { %v1870_v18 = vsel %vm239_vm4, %v1866_v2, 0.0 }
 0xe53   :  { %1871 = vadd.xlane.f32.xlu1 %v1870_v18 }
 0xebe   :  { %v1869_v41 = vpop.xlane.xlu1 %1868 }
 0xebf   :  { %v1873_v55 = vmul.f32 %v1869_v41, %v2727_v29 }
 0xec1   :  { %v1875_v43 = vadd.f32 1e-06, %v1873_v55 }
 0xec3   :  { %2329 = vrsqrt.f32 %v1875_v43  ;;  %vm1883_vm7 = vweird.f32 %v1875_v43 }
 0xec6   :  { %v1872_v10 = vpop.xlane.xlu1 %1871 }
 0xec7   :  { %v1874_v45 = vmul.f32 %v1872_v10, %v2727_v29  ;;  %v2245_v29 = vld [vmem:[%s3120_s11] ss:$0 sm:$0xff] }
 0xec9   :  { %v2330_v46 = vpop.eup %2329  ;;  %v1876_v3 = vadd.f32 1e-06, %v1874_v45 }
 0xeca   :  { %v1878_v1 = vmul.f32 %v2330_v46, %v1875_v43  ;;  %vm1884_vm6 = vweird.f32 %v2330_v46 }
 0xecb   :  { %2331 = vrsqrt.f32 %v1876_v3  ;;  %vm1885_vm8 = vmor %vm1883_vm7, %vm1884_vm6  ;;  %vm1893_vm10 = vweird.f32 %v1876_v3 }
 0xecc   :  { %v1879_v16 = vmul.f32 %v2330_v46, %v1878_v1 }
 0xece   :  { %v1880_v47 = vmul.f32 0.5, %v1879_v16 }
 0xed0   :  { %v1881_v48 = vsub.f32 1.5, %v1880_v47 }
 0xed1   :  { %v2332_v49 = vpop.eup %2331 }
 0xed2   :  { %v1888_v50 = vmul.f32 %v2332_v49, %v1876_v3  ;;  %v1882_v51 = vmul.f32 %v2330_v46, %v1881_v48  ;;  %vm1894_vm9 = vweird.f32 %v2332_v49 }
 0xed3   :  { %vm1895_vm11 = vmor %vm1893_vm10, %vm1894_vm9 }
 0xed4   :  { %v1889_v52 = vmul.f32 %v2332_v49, %v1888_v50  ;;  %v1886_v14 = vsel %vm1885_vm8, %v2330_v46, %v1882_v51 }
 0xed5   :  { %v1897_v54 = vmul.f32 %v1886_v14, %v1862_v30 }
 0xed6   :  { %v1890_v53 = vmul.f32 0.5, %v1889_v52 }
 0xed7   :  { %v1902_v56 = vmul.f32 %v2245_v29, %v1897_v54 }
 0xed8   :  { %v1891_v36 = vsub.f32 1.5, %v1890_v53 }
 0xeda   :  { %v1892_v44 = vmul.f32 %v2332_v49, %v1891_v36 }
 0xedc   :  { %v1896_v31 = vsel %vm1895_vm11, %v2332_v49, %v1892_v44 }
 0xedd   :  { %v1898_v34 = vmul.f32 %v1896_v31, %v1863_v37 }
 0xedf   :  { %v1903_v57 = vmul.f32 %v2245_v29, %v1898_v34 }
 0xee1   :  { %v1904_v17 = vpack.c.bf16 %v1903_v57, %v1902_v56 }
 0xee3   :  { %2158 = vmatmul.msk.bf16.vlgmr.msrb.gmra.mxu1 %vm239_vm4, %v1904_v17 }
 0xf60   :  { %v1937_v27 = vpop.f32.mrf.mxu1 }
 0xf61   :  { %v1938_v60 = vadd.f32 %v2246_v58, %v1937_v27 }
 0xf63   :  { %1942 = vst [vmem:[#allocation16] sm:$0xff] %v1938_v60 }
 0xf68   :  { %v1939_v59 = vpop.f32.mrf.mxu1 }
 0xf69   :  { %v1940_v61 = vadd.f32 %v2246_v58, %v1939_v59 }
 0xf6b   :  { %1943 = vst [vmem:[#allocation16 + $0x8] sm:$0xff] %v1940_v61 }
 0xf6c   :  { %1956 = dma.vmem_to_hbm [thread:$0]  %s1949_s12, 256, %s1951_s0, [#allocation4], %s2569_s20, %s2569_s20, %s2570_s21  }
 0xf6d   :  { %2559 = dma.done.wait [#allocation4], 256  }
 0xf6e   :  { %2560 = vsyncadd [#allocation4], 4294967040 }
 0xf6f   :  { %1961 = vsyncpa [#allocation3], 1 }
 0xf70   :  { %1962 = vsyncpa [#allocation6], 1 }
 0xf71   :  { %1963 = vsyncpa [#allocation9], 1 }
 0xf72   :  { %1964 = vsyncpa [#allocation12], 1 }
 0xf73   :  { %1965 = vsyncpa [#allocation15], 1 }
 0xf74   :  { %1966 = vsyncpa [#allocation4], 1 }

</bundles_post_ra>
